<compile_context>
chip_gen: v7x
topology: tpu7x:2x2x1
jax: 0.10.0
libtpu: 0.0.40
codegen_flags: <defaults>
</compile_context>

<pallas_src>
import math
import functools

import jax
import jax.numpy as jnp
from jax import lax
from jax.experimental import pallas as pl
from jax.experimental.pallas import tpu as pltpu

LOG_NORM_CONST = -0.5 * math.log(2.0 * math.pi)
BN_EPS = 1e-5
BN_SCALE = 1.0 / math.sqrt(1.0 + BN_EPS)
# Set to jnp.bfloat16 on v6e/v7x for ~2x MXU throughput (tolerance ~1e-2 rel).
COMPUTE_DTYPE = jnp.float32

_VMEM = pl.BlockSpec(memory_space=pltpu.MemorySpace.VMEM)


def _vmem_call(kernel, out_shape, n_in):
    multi = isinstance(out_shape, (tuple, list))
    return pl.pallas_call(
        kernel,
        out_shape=tuple(out_shape) if multi else out_shape,
        in_specs=[_VMEM] * n_in,
        out_specs=tuple([_VMEM] * len(out_shape)) if multi else _VMEM,
    )


# ----------------------------- shared helpers ------------------------------

def _softplus(x):
    # numerically stable softplus, avoids relying on log1p lowering
    return jnp.maximum(x, 0.0) + jnp.log(1.0 + jnp.exp(-jnp.abs(x)))


def _gauss_mix_logprob(z, mu, lv, logpi):
    """MXU form of sum_d N(z | mu_k, exp(lv_k)) + log pi_k.

    logp[n,k] = -0.5*( (z*z)@inv_k - 2 z@(mu_k*inv_k) + sum_d(lv_k + mu_k^2*inv_k) )
                + D*LOG_NORM_CONST + logpi[k],   inv = exp(-lv)
    """
    d = z.shape[1]
    inv = jnp.exp(-lv)                                                  # [K, D]
    quad = lax.dot_general(z * z, inv, (((1,), (1,)), ((), ())),
                           preferred_element_type=jnp.float32)          # [N, K]
    cross = lax.dot_general(z, mu * inv, (((1,), (1,)), ((), ())),
                            preferred_element_type=jnp.float32)         # [N, K]
    ones_row = jnp.ones((1, d), jnp.float32)
    const = lax.dot_general(ones_row, lv + mu * mu * inv,
                            (((1,), (1,)), ((), ())),
                            preferred_element_type=jnp.float32)         # [1, K]
    return -0.5 * (quad - 2.0 * cross + const) + d * LOG_NORM_CONST + logpi


# ----------------------- kernel A: tiled BoW encoder ------------------------

def _encoder_kernel(x_ref, w1_ref, b1_ref, w2_ref, b2_ref, o_ref, acc_ref):
    k = pl.program_id(1)

    @pl.when(k == 0)
    def _():
        acc_ref[...] = jnp.zeros_like(acc_ref)

    acc_ref[...] += jnp.dot(x_ref[...], w1_ref[...],
                            preferred_element_type=jnp.float32)

    @pl.when(k == pl.num_programs(1) - 1)
    def _():
        # TODO(synk): BatchNorm1d folded with fresh running stats (mean=0, var=1,
        # gamma=1, beta=0) -> x / sqrt(1 + eps); trained stats would change this.
        h = jnp.tanh((acc_ref[...] + b1_ref[...]) * BN_SCALE)
        h = jnp.dot(h, w2_ref[...], preferred_element_type=jnp.float32) + b2_ref[...]
        o_ref[...] = jnp.tanh(h * BN_SCALE)


def _tile(dim, target):
    if dim <= target or dim % target != 0:
        return dim
    return target


def pl_shared_encoder(x, w1, b1, w2, b2, *, tm_target=256, tk_target=512):
    m, v = x.shape
    h = w1.shape[1]
    tm = _tile(m, tm_target)        # batch tile (parallel / megacore axis)
    tk = _tile(v, tk_target)        # vocab reduction tile (128-aligned when tiled)
    grid = (m // tm, v // tk)
    return pl.pallas_call(
        _encoder_kernel,
        out_shape=jax.ShapeDtypeStruct((m, h), jnp.float32),
        grid=grid,
        in_specs=[
            pl.BlockSpec((tm, tk), lambda i, k: (i, k)),
            pl.BlockSpec((tk, h), lambda i, k: (k, 0)),
            pl.BlockSpec((1, h), lambda i, k: (0, 0)),
            pl.BlockSpec((h, h), lambda i, k: (0, 0)),
            pl.BlockSpec((1, h), lambda i, k: (0, 0)),
        ],
        out_specs=pl.BlockSpec((tm, h), lambda i, k: (i, 0)),
        scratch_shapes=[pltpu.VMEM((tm, h), jnp.float32)],
        compiler_params=pltpu.CompilerParams(
            dimension_semantics=("parallel", "arbitrary"),
            vmem_limit_bytes=32 * 1024 * 1024),
    )(x.astype(COMPUTE_DTYPE), w1.astype(COMPUTE_DTYPE), b1,
      w2.astype(COMPUTE_DTYPE), b2)


# ------------- kernel B: fused q(c|X) + q(theta|X,c) posterior heads --------

def _heads_kernel(h_ref, att_w_ref, att_hw_ref, att_hb_ref,
                  c_w_ref, c_b_ref,
                  w1h_ref, w1c_ref, b1_ref, w2_ref, b2_ref,
                  thw_ref, thb_ref,
                  c_out_ref, th_out_ref):
    hid = h_ref[...]                                                    # [B, H]
    k = c_out_ref.shape[1] // 2                                         # num_topics

    # --- attentive pooling statistic network: q(c | X) ---
    # TODO(synk): AttentiveStatistiC source not provided; attention-pooled
    # statistic net assumed.
    scores = jnp.sum(hid * att_w_ref[...], axis=1, keepdims=True)       # [B, 1]
    scores = scores - jnp.max(scores, axis=0, keepdims=True)
    e = jnp.exp(scores)
    attn = e / jnp.sum(e, axis=0, keepdims=True)
    pooled = jnp.sum(attn * hid, axis=0, keepdims=True)                 # [1, H]
    h_c = jnp.tanh(jnp.dot(pooled, att_hw_ref[...],
                           preferred_element_type=jnp.float32) + att_hb_ref[...])
    c_ml = jnp.dot(h_c, c_w_ref[...],
                   preferred_element_type=jnp.float32) + c_b_ref[...]   # [1, 2K]
    c_out_ref[...] = c_ml
    c_sample = c_ml[:, :k]                                              # eval-mode sample

    # --- theta posterior on (hidden, c) without materializing the concat ---
    # TODO(synk): ThetaPosteriorNet source not provided; 2-layer MLP on
    # concat(H, c) assumed, with w1 split into hidden / c row blocks.
    h1 = jnp.tanh(
        jnp.dot(hid, w1h_ref[...], preferred_element_type=jnp.float32)
        + jnp.dot(c_sample, w1c_ref[...], preferred_element_type=jnp.float32)
        + b1_ref[...])
    h2 = jnp.tanh(jnp.dot(h1, w2_ref[...],
                          preferred_element_type=jnp.float32) + b2_ref[...])
    th_out_ref[...] = (jnp.dot(h2, thw_ref[...],
                               preferred_element_type=jnp.float32)
                       + thb_ref[...])                                  # [B, 2K]


def pl_heads(hidden, p):
    b = hidden.shape[0]
    two_k = p['c_head_w'].shape[1]
    out_shape = (jax.ShapeDtypeStruct((1, two_k), jnp.float32),
                 jax.ShapeDtypeStruct((b, two_k), jnp.float32))
    return _vmem_call(_heads_kernel, out_shape, 13)(
        hidden, p['att_w'], p['att_hw'], p['att_hb'],
        p['c_head_w'], p['c_head_b'],
        p['th_w1h'], p['th_w1c'], p['th_b1'], p['th_w2'], p['th_b2'],
        p['th_head_w'], p['th_head_b'])


# ---------------- kernel C: fused VGAE-style graph encoder ------------------

def _graph_encoder_kernel(adj_ref, ind_ref, rho_ref, w1_ref, b1_ref,
                          hw_ref, hb_ref, o_ref):
    # TODO(synk): GraphEncoder source not provided; VGAE-style 2-layer GCN with
    # symmetric-normalized adjacency assumed.
    adj = adj_ref[...]
    deg_r = jnp.sum(adj, axis=1, keepdims=True)                         # [N, 1]
    deg_c = jnp.sum(adj, axis=0, keepdims=True)                         # [1, N]
    dinv_r = jnp.where(deg_r > 0, lax.rsqrt(deg_r), 0.0)
    dinv_c = jnp.where(deg_c > 0, lax.rsqrt(deg_c), 0.0)
    a_n = dinv_r * adj * dinv_c

    # TODO(synk): for one-hot `ind` and a large vocab this should be a DMA gather
    # of rho rows; kept as a matmul to preserve torch.mm(ind, rho) semantics for
    # arbitrary indicator matrices.
    feats = jnp.dot(ind_ref[...], rho_ref[...],
                    preferred_element_type=jnp.float32)                 # [N, E]
    ax = jnp.dot(a_n, feats, preferred_element_type=jnp.float32)
    h = jnp.tanh(jnp.dot(ax, w1_ref[...],
                         preferred_element_type=jnp.float32) + b1_ref[...])
    ah = jnp.dot(a_n, h, preferred_element_type=jnp.float32)
    o_ref[...] = (jnp.dot(ah, hw_ref[...],
                          preferred_element_type=jnp.float32)
                  + hb_ref[...])                                        # [N, 2D]


def pl_graph_encoder(adj, ind, p):
    n = adj.shape[0]
    two_d = p['g_head_w'].shape[1]
    return _vmem_call(_graph_encoder_kernel,
                      jax.ShapeDtypeStruct((n, two_d), jnp.float32), 7)(
        adj, ind, p['rho'], p['g_w1'], p['g_b1'], p['g_head_w'], p['g_head_b'])


# --------------- kernel D: GMM log-likelihood (MXU quadratic form) ----------

def _gmm_loglik_kernel(z_ref, mu_ref, lv_ref, logpi_ref, o_ref):
    o_ref[...] = _gauss_mix_logprob(z_ref[...], mu_ref[...], lv_ref[...],
                                    logpi_ref[...])


def pl_gmm_loglik(z, mu, logvar, logpi):
    n = z.shape[0]
    k = mu.shape[0]
    return _vmem_call(_gmm_loglik_kernel,
                      jax.ShapeDtypeStruct((n, k), jnp.float32), 4)(
        z, mu, logvar, logpi)


# ------------------------ kernel E: fused EM step ---------------------------

def _em_step_kernel(z_ref, mu_ref, lv_ref, logpi_ref,
                    pi_ref, mu_out_ref, ls_out_ref):
    z = z_ref[...]                                                      # [N, D]
    n = z.shape[0]
    wlp = _gauss_mix_logprob(z, mu_ref[...], lv_ref[...], logpi_ref[...])  # [N, K]

    # E-step: responsibilities (row softmax)
    m = jnp.max(wlp, axis=-1, keepdims=True)
    e = jnp.exp(wlp - m)
    resp = e / jnp.sum(e, axis=-1, keepdims=True)                       # [N, K]

    # M-step, MXU form (no [N,K,D] temporaries).
    ones_col = jnp.ones((n, 1), jnp.float32)
    nk_col = lax.dot_general(resp, ones_col, (((0,), (0,)), ((), ())),
                             preferred_element_type=jnp.float32)        # [K, 1]
    nk_row = jnp.sum(resp, axis=0, keepdims=True)                       # [1, K]
    pi_ref[...] = nk_row / jnp.sum(nk_row, axis=1, keepdims=True)
    rz = lax.dot_general(resp, z, (((0,), (0,)), ((), ())),
                         preferred_element_type=jnp.float32)            # [K, D]
    rzz = lax.dot_general(resp, z * z, (((0,), (0,)), ((), ())),
                          preferred_element_type=jnp.float32)           # [K, D]
    mu_new = rz / nk_col
    sigma2 = jnp.maximum(rzz / nk_col - mu_new * mu_new, 0.0)
    mu_out_ref[...] = mu_new
    ls_out_ref[...] = jnp.log(sigma2 + 1e-8)


def pl_em_step(z, mu, log_sigma2, logpi):
    n, d = z.shape
    k = mu.shape[0]
    out_shape = (jax.ShapeDtypeStruct((1, k), jnp.float32),
                 jax.ShapeDtypeStruct((k, d), jnp.float32),
                 jax.ShapeDtypeStruct((k, d), jnp.float32))
    return _vmem_call(_em_step_kernel, out_shape, 4)(z, mu, log_sigma2, logpi)


# -------- kernel F: inner-product decoder fused with weighted BCE -----------

def _graph_bce_kernel(z_ref, adj_ref, o_ref):
    z = z_ref[...]
    adj = adj_ref[...]
    n = adj.shape[0]
    logits = lax.dot_general(z, z, (((1,), (1,)), ((), ())),
                             preferred_element_type=jnp.float32)        # [N, N]
    # BCE on sigmoid(logits), computed in logit space; PyTorch clamps logs at -100.
    log_p = jnp.maximum(-_softplus(-logits), -100.0)
    log_1mp = jnp.maximum(-_softplus(logits), -100.0)
    adj_sum = jnp.sum(jnp.sum(adj, axis=1, keepdims=True),
                      axis=0, keepdims=True)                            # (1, 1)
    pos_w = (n * n - adj_sum) / adj_sum
    w = jnp.where(adj == 1.0, pos_w, 1.0)
    loss = -w * (adj * log_p + (1.0 - adj) * log_1mp)
    tot = jnp.sum(jnp.sum(loss, axis=1, keepdims=True), axis=0, keepdims=True)
    o_ref[...] = tot / (n * n)


def pl_graph_bce(z, adj):
    out = _vmem_call(_graph_bce_kernel,
                     jax.ShapeDtypeStruct((1, 1), jnp.float32), 2)(z, adj)
    return out[0, 0]


# --------- kernel G: fused t_over_w / beta / X_rec / bow likelihood ---------

def _bow_kernel(ll_ref, ind_ref, th_ref, x_ref, o_ref):
    ll = ll_ref[...]                                                    # [N, K]
    # F.normalize(dim=1): row-wise L2 with eps = 1e-12
    nrm = ll / jnp.maximum(
        jnp.sqrt(jnp.sum(ll * ll, axis=1, keepdims=True)), 1e-12)
    # softmax over nodes (dim 0)
    m = jnp.max(nrm, axis=0, keepdims=True)
    e = jnp.exp(nrm - m)
    t_over_w = e / jnp.sum(e, axis=0, keepdims=True)                    # [N, K]
    # beta = ind^T @ t_over_w without an XLA transpose
    beta = lax.dot_general(ind_ref[...], t_over_w, (((0,), (0,)), ((), ())),
                           preferred_element_type=jnp.float32)          # [V, K]
    # theta = softmax(theta_sample)
    ts = th_ref[...]                                                    # [B, K]
    tmax = jnp.max(ts, axis=-1, keepdims=True)
    te = jnp.exp(ts - tmax)
    theta = te / jnp.sum(te, axis=-1, keepdims=True)
    # X_rec = theta @ beta^T without an XLA transpose
    x_rec = lax.dot_general(theta, beta, (((1,), (1,)), ((), ())),
                            preferred_element_type=jnp.float32)         # [B, V]
    b = x_ref.shape[0]
    per_row = jnp.sum(-jnp.log(x_rec + 1e-8) * x_ref[...], axis=1, keepdims=True)
    o_ref[...] = jnp.sum(per_row, axis=0, keepdims=True) / b


def pl_bow_likelihood(log_likelihoods, ind, theta_sample, X):
    out = _vmem_call(_bow_kernel,
                     jax.ShapeDtypeStruct((1, 1), jnp.float32), 4)(
        log_likelihoods, ind, theta_sample, X)
    return out[0, 0]


# ------------------------------- parameters --------------------------------

def init_params(key, vocab_size, embed_size, num_topics, num_hiddens, z_dim,
                graph_h_dim):
    keys = jax.random.split(key, 16)

    def nrm(k, shape, std=0.02):
        return (std * jax.random.normal(k, shape)).astype(jnp.float32)

    zeros = lambda shape: jnp.zeros(shape, jnp.float32)
    p = {}
    p['rho'] = nrm(keys[0], (vocab_size, embed_size))
    # shared_x_encoder (Linear+BN+tanh x2); fresh BN running stats folded into kernel.
    p['enc_w1'] = nrm(keys[1], (vocab_size, num_hiddens)); p['enc_b1'] = zeros((1, num_hiddens))
    p['enc_w2'] = nrm(keys[2], (num_hiddens, num_hiddens)); p['enc_b2'] = zeros((1, num_hiddens))
    # attentive statistic net; fused [mean | logvar] head -> lane-dense [1, 2K]
    p['att_w'] = nrm(keys[3], (1, num_hiddens))
    p['att_hw'] = nrm(keys[4], (num_hiddens, num_hiddens)); p['att_hb'] = zeros((1, num_hiddens))
    p['c_head_w'] = nrm(keys[5], (num_hiddens, 2 * num_topics)); p['c_head_b'] = zeros((1, 2 * num_topics))
    # theta posterior net; w1 split into hidden / c row blocks, fused [*, 2K] head
    p['th_w1h'] = nrm(keys[6], (num_hiddens, num_hiddens))
    p['th_w1c'] = nrm(keys[7], (num_topics, num_hiddens))
    p['th_b1'] = zeros((1, num_hiddens))
    p['th_w2'] = nrm(keys[8], (num_hiddens, num_hiddens)); p['th_b2'] = zeros((1, num_hiddens))
    p['th_head_w'] = nrm(keys[9], (num_hiddens, 2 * num_topics)); p['th_head_b'] = zeros((1, 2 * num_topics))
    # graph encoder; fused [*, 2D] mean|logvar head
    p['g_w1'] = nrm(keys[10], (embed_size, graph_h_dim)); p['g_b1'] = zeros((1, graph_h_dim))
    p['g_head_w'] = nrm(keys[11], (graph_h_dim, 2 * z_dim)); p['g_head_b'] = zeros((1, 2 * z_dim))
    return p


# --------------------------------- model -----------------------------------

def kl_normal_normal(q_mean, q_logvar, p_mean=None, p_logvar=None):
    if p_mean is not None and p_logvar is not None:
        kl = 0.5 * jnp.sum(((q_mean - p_mean) ** 2 + jnp.exp(q_logvar))
                           / (jnp.exp(p_logvar) + 1e-8)
                           - 1.0 - q_logvar + p_logvar, axis=-1)
    else:
        kl = 0.5 * jnp.sum(q_mean ** 2 + jnp.exp(q_logvar) - 1.0 - q_logvar, axis=-1)
    return jnp.mean(kl)


def get_z_mixture_prior(z, num_topics, em_iterations, fix_pi, select_key):
    # TODO(synk): original uses np.random.choice (non-deterministic); fixed-key
    # permutation here.
    perm = jax.random.permutation(select_key, z.shape[0])[:num_topics]
    mu = z[perm]
    log_sigma2 = jnp.zeros_like(mu)
    pi = jnp.full((1, num_topics), 1.0 / num_topics, jnp.float32)
    for _ in range(em_iterations):
        pi_new, mu, log_sigma2 = pl_em_step(z, mu, log_sigma2, jnp.log(pi))
        if not fix_pi:
            pi = pi_new
    return pi, mu, log_sigma2


def forward(params, X, adj, ind, cfg):
    K = cfg['num_topics']

    # --- BoW encoder (vocab-tiled Pallas kernel) ---
    X_norm = X / jnp.sum(X, axis=1, keepdims=True)
    hidden = pl_shared_encoder(X_norm, params['enc_w1'], params['enc_b1'],
                               params['enc_w2'], params['enc_b2'])          # [B, H]

    # --- fused q(c | X) + q(theta | X, c) heads (single kernel) ---
    c_ml, theta_ml = pl_heads(hidden, params)
    c_mean, c_logvar = c_ml[:, :K], c_ml[:, K:]
    c_sample = c_mean                                                       # eval-mode
    theta_mean, theta_logvar = theta_ml[:, :K], theta_ml[:, K:]
    theta_sample = theta_mean                                               # eval-mode

    c_kl = kl_normal_normal(c_mean, c_logvar)
    theta_kl = kl_normal_normal(theta_mean, theta_logvar,
                                p_mean=jnp.broadcast_to(c_sample, theta_mean.shape),
                                p_logvar=jnp.zeros_like(theta_logvar))

    # --- fused graph encoder (adj normalization + 2-layer GCN + heads) ---
    z_ml = pl_graph_encoder(adj, ind, params)                               # [N, 2D]
    D = z_ml.shape[1] // 2
    z_mean, z_logvar = z_ml[:, :D], z_ml[:, D:]
    z_sample = z_mean                                                       # eval-mode

    gmm_pi, gmm_mu, gmm_logvar = get_z_mixture_prior(
        z_sample, K, cfg['em_iterations'], cfg['fix_pi'],
        jax.random.PRNGKey(cfg['em_select_seed']))

    log_qz = jnp.sum(-0.5 * (1.0 + z_logvar) + LOG_NORM_CONST, axis=-1)     # [N]
    log_likelihoods = pl_gmm_loglik(z_sample, gmm_mu, gmm_logvar,
                                    jnp.log(gmm_pi))                        # [N, K]
    log_pz = jax.scipy.special.logsumexp(log_likelihoods, axis=-1)
    z_kl = jnp.mean(log_qz - log_pz)

    # --- inner-product decoder fused with weighted BCE (logit-space) ---
    graph_likelihood = pl_graph_bce(z_sample, adj)

    # --- t_over_w / beta / X_rec / bow likelihood fused ---
    bow_likelihood = pl_bow_likelihood(log_likelihoods, ind, theta_sample, X)

    elbo = bow_likelihood + 0.1 * (c_kl + theta_kl) + (graph_likelihood + z_kl)
    return elbo, bow_likelihood, graph_likelihood, c_kl, theta_kl, z_kl, ind.T


# ---------------------------------- main ------------------------------------

if __name__ == "__main__":
    B, V, E, K, H, D, G, N = 8, 64, 16, 8, 32, 8, 16, 32
    cfg = dict(num_topics=K, em_iterations=3, em_select_seed=0, fix_pi=False)

    key = jax.random.PRNGKey(0)
    pk, xk, ak = jax.random.split(key, 3)
    params = init_params(pk, vocab_size=V, embed_size=E, num_topics=K,
                         num_hiddens=H, z_dim=D, graph_h_dim=G)

    X = jax.random.uniform(xk, (B, V), jnp.float32, 0.0, 5.0)               # BoW counts
    a = (jax.random.uniform(ak, (N, N)) < 0.2).astype(jnp.float32)
    adj = jnp.clip(a + a.T + jnp.eye(N, dtype=jnp.float32), 0.0, 1.0)       # symmetric 0/1 adj
    ind = jax.nn.one_hot(jnp.arange(N) % V, V, dtype=jnp.float32)           # node->vocab indicator

    fwd = jax.jit(functools.partial(forward, cfg=cfg))
    out = fwd(params, X, adj, ind)
    jax.block_until_ready(out)
    print("KERNEL_OK")
</pallas_src>

<mosaic_0001>
module attributes {stable_mosaic.version = 11 : i64} {
  func.func @_graph_encoder_kernel(%arg0: memref<32x32xf32, #tpu.memory_space<vmem>>, %arg1: memref<32x64xf32, #tpu.memory_space<vmem>>, %arg2: memref<64x16xf32, #tpu.memory_space<vmem>>, %arg3: memref<16x16xf32, #tpu.memory_space<vmem>>, %arg4: memref<1x16xf32, #tpu.memory_space<vmem>>, %arg5: memref<16x16xf32, #tpu.memory_space<vmem>>, %arg6: memref<1x16xf32, #tpu.memory_space<vmem>>, %arg7: memref<32x16xf32, #tpu.memory_space<vmem>>) attributes {dimension_semantics = [], scalar_prefetch = 0 : i64, scratch_operands = 0 : i64, tpu.core_type = #tpu.core_type<tc>} {
    %c0 = arith.constant 0 : index
    %c0_0 = arith.constant 0 : index
    %0 = vector.load %arg0[%c0, %c0_0] : memref<32x32xf32, #tpu.memory_space<vmem>>, vector<32x32xf32>
    %cst = arith.constant dense<0.000000e+00> : vector<32xf32>
    %1 = vector.multi_reduction <add>, %0, %cst [1] : vector<32x32xf32> to vector<32xf32>
    %2 = vector.shape_cast %1 : vector<32xf32> to vector<32x1xf32>
    %cst_1 = arith.constant dense<0.000000e+00> : vector<32xf32>
    %3 = vector.multi_reduction <add>, %0, %cst_1 [0] : vector<32x32xf32> to vector<32xf32>
    %4 = vector.shape_cast %3 : vector<32xf32> to vector<1x32xf32>
    %cst_2 = arith.constant 0.000000e+00 : f32
    %5 = vector.broadcast %cst_2 : f32 to vector<32x1xf32>
    %6 = arith.cmpf ogt, %2, %5 : vector<32x1xf32>
    %7 = math.rsqrt %2 : vector<32x1xf32>
    %cst_3 = arith.constant 0.000000e+00 : f32
    %8 = vector.broadcast %cst_3 : f32 to vector<32x1xf32>
    %9 = arith.select %6, %7, %8 : vector<32x1xi1>, vector<32x1xf32>
    %cst_4 = arith.constant 0.000000e+00 : f32
    %10 = vector.broadcast %cst_4 : f32 to vector<1x32xf32>
    %11 = arith.cmpf ogt, %4, %10 : vector<1x32xf32>
    %12 = math.rsqrt %4 : vector<1x32xf32>
    %cst_5 = arith.constant 0.000000e+00 : f32
    %13 = vector.broadcast %cst_5 : f32 to vector<1x32xf32>
    %14 = arith.select %11, %12, %13 : vector<1x32xi1>, vector<1x32xf32>
    %15 = vector.broadcast %9 : vector<32x1xf32> to vector<32x32xf32>
    %16 = arith.mulf %15, %0 : vector<32x32xf32>
    %17 = vector.broadcast %14 : vector<1x32xf32> to vector<32x32xf32>
    %18 = arith.mulf %16, %17 : vector<32x32xf32>
    %c0_6 = arith.constant 0 : index
    %c0_7 = arith.constant 0 : index
    %19 = vector.load %arg1[%c0_6, %c0_7] : memref<32x64xf32, #tpu.memory_space<vmem>>, vector<32x64xf32>
    %c0_8 = arith.constant 0 : index
    %c0_9 = arith.constant 0 : index
    %20 = vector.load %arg2[%c0_8, %c0_9] : memref<64x16xf32, #tpu.memory_space<vmem>>, vector<64x16xf32>
    %cst_10 = arith.constant dense<0.000000e+00> : vector<32x16xf32>
    %21 = tpu.matmul %19, %20, %cst_10 {dimension_numbers = #tpu.dot_dimension_numbers<[1], [0], [0], [1], [0, 0, 1, 1], [], []>} : vector<32x64xf32>, vector<64x16xf32>, vector<32x16xf32> -> vector<32x16xf32>
    %cst_11 = arith.constant dense<0.000000e+00> : vector<32x16xf32>
    %22 = tpu.matmul %18, %21, %cst_11 {dimension_numbers = #tpu.dot_dimension_numbers<[1], [0], [0], [1], [0, 0, 1, 1], [], []>} : vector<32x32xf32>, vector<32x16xf32>, vector<32x16xf32> -> vector<32x16xf32>
    %c0_12 = arith.constant 0 : index
    %c0_13 = arith.constant 0 : index
    %23 = vector.load %arg3[%c0_12, %c0_13] : memref<16x16xf32, #tpu.memory_space<vmem>>, vector<16x16xf32>
    %cst_14 = arith.constant dense<0.000000e+00> : vector<32x16xf32>
    %24 = tpu.matmul %22, %23, %cst_14 {dimension_numbers = #tpu.dot_dimension_numbers<[1], [0], [0], [1], [0, 0, 1, 1], [], []>} : vector<32x16xf32>, vector<16x16xf32>, vector<32x16xf32> -> vector<32x16xf32>
    %c0_15 = arith.constant 0 : index
    %c0_16 = arith.constant 0 : index
    %25 = vector.load %arg4[%c0_15, %c0_16] : memref<1x16xf32, #tpu.memory_space<vmem>>, vector<1x16xf32>
    %26 = vector.broadcast %25 : vector<1x16xf32> to vector<32x16xf32>
    %27 = arith.addf %24, %26 : vector<32x16xf32>
    %28 = math.tanh %27 : vector<32x16xf32>
    %cst_17 = arith.constant dense<0.000000e+00> : vector<32x16xf32>
    %29 = tpu.matmul %18, %28, %cst_17 {dimension_numbers = #tpu.dot_dimension_numbers<[1], [0], [0], [1], [0, 0, 1, 1], [], []>} : vector<32x32xf32>, vector<32x16xf32>, vector<32x16xf32> -> vector<32x16xf32>
    %c0_18 = arith.constant 0 : index
    %c0_19 = arith.constant 0 : index
    %30 = vector.load %arg5[%c0_18, %c0_19] : memref<16x16xf32, #tpu.memory_space<vmem>>, vector<16x16xf32>
    %cst_20 = arith.constant dense<0.000000e+00> : vector<32x16xf32>
    %31 = tpu.matmul %29, %30, %cst_20 {dimension_numbers = #tpu.dot_dimension_numbers<[1], [0], [0], [1], [0, 0, 1, 1], [], []>} : vector<32x16xf32>, vector<16x16xf32>, vector<32x16xf32> -> vector<32x16xf32>
    %c0_21 = arith.constant 0 : index
    %c0_22 = arith.constant 0 : index
    %32 = vector.load %arg6[%c0_21, %c0_22] : memref<1x16xf32, #tpu.memory_space<vmem>>, vector<1x16xf32>
    %33 = vector.broadcast %32 : vector<1x16xf32> to vector<32x16xf32>
    %34 = arith.addf %31, %33 : vector<32x16xf32>
    %c0_23 = arith.constant 0 : index
    %c0_24 = arith.constant 0 : index
    %35 = vector.load %arg7[%c0_23, %c0_24] : memref<32x16xf32, #tpu.memory_space<vmem>>, vector<32x16xf32>
    tpu.vector_store %arg7[%c0_23, %c0_24], %34 {strides = array<i32>} : memref<32x16xf32, #tpu.memory_space<vmem>>, vector<32x16xf32>,
    return
  }
}

module attributes {stable_mosaic.version = 11 : i64} {
  func.func @_em_step_kernel(%arg0: memref<32x8xf32, #tpu.memory_space<vmem>>, %arg1: memref<8x8xf32, #tpu.memory_space<vmem>>, %arg2: memref<8x8xf32, #tpu.memory_space<vmem>>, %arg3: memref<1x8xf32, #tpu.memory_space<vmem>>, %arg4: memref<1x8xf32, #tpu.memory_space<vmem>>, %arg5: memref<8x8xf32, #tpu.memory_space<vmem>>, %arg6: memref<8x8xf32, #tpu.memory_space<vmem>>) attributes {dimension_semantics = [], scalar_prefetch = 0 : i64, scratch_operands = 0 : i64, tpu.core_type = #tpu.core_type<tc>} {
    %c0 = arith.constant 0 : index
    %c0_0 = arith.constant 0 : index
    %0 = vector.load %arg0[%c0, %c0_0] : memref<32x8xf32, #tpu.memory_space<vmem>>, vector<32x8xf32>
    %c0_1 = arith.constant 0 : index
    %c0_2 = arith.constant 0 : index
    %1 = vector.load %arg1[%c0_1, %c0_2] : memref<8x8xf32, #tpu.memory_space<vmem>>, vector<8x8xf32>
    %c0_3 = arith.constant 0 : index
    %c0_4 = arith.constant 0 : index
    %2 = vector.load %arg2[%c0_3, %c0_4] : memref<8x8xf32, #tpu.memory_space<vmem>>, vector<8x8xf32>
    %c0_5 = arith.constant 0 : index
    %c0_6 = arith.constant 0 : index
    %3 = vector.load %arg3[%c0_5, %c0_6] : memref<1x8xf32, #tpu.memory_space<vmem>>, vector<1x8xf32>
    %cst = arith.constant 0.000000e+00 : f32
    %4 = vector.broadcast %cst : f32 to vector<8x8xf32>
    %5 = arith.subf %4, %2 : vector<8x8xf32>
    %6 = math.exp %5 : vector<8x8xf32>
    %7 = arith.mulf %0, %0 : vector<32x8xf32>
    %cst_7 = arith.constant dense<0.000000e+00> : vector<32x8xf32>
    %8 = tpu.matmul %7, %6, %cst_7 {dimension_numbers = #tpu.dot_dimension_numbers<[1], [1], [0], [0], [0, 0, 1, 0], [], []>} : vector<32x8xf32>, vector<8x8xf32>, vector<32x8xf32> -> vector<32x8xf32>
    %9 = arith.mulf %1, %6 : vector<8x8xf32>
    %cst_8 = arith.constant dense<0.000000e+00> : vector<32x8xf32>
    %10 = tpu.matmul %0, %9, %cst_8 {dimension_numbers = #tpu.dot_dimension_numbers<[1], [1], [0], [0], [0, 0, 1, 0], [], []>} : vector<32x8xf32>, vector<8x8xf32>, vector<32x8xf32> -> vector<32x8xf32>
    %cst_9 = arith.constant 1.000000e+00 : f32
    %11 = vector.broadcast %cst_9 : f32 to vector<1x8xf32>
    %12 = arith.mulf %1, %1 : vector<8x8xf32>
    %13 = arith.mulf %12, %6 : vector<8x8xf32>
    %14 = arith.addf %2, %13 : vector<8x8xf32>
    %cst_10 = arith.constant dense<0.000000e+00> : vector<1x8xf32>
    %15 = tpu.matmul %11, %14, %cst_10 {dimension_numbers = #tpu.dot_dimension_numbers<[1], [1], [0], [0], [0, 0, 1, 0], [], []>} : vector<1x8xf32>, vector<8x8xf32>, vector<1x8xf32> -> vector<1x8xf32>
    %cst_11 = arith.constant 2.000000e+00 : f32
    %16 = vector.broadcast %cst_11 : f32 to vector<32x8xf32>
    %17 = arith.mulf %16, %10 : vector<32x8xf32>
    %18 = arith.subf %8, %17 : vector<32x8xf32>
    %19 = vector.broadcast %15 : vector<1x8xf32> to vector<32x8xf32>
    %20 = arith.addf %18, %19 : vector<32x8xf32>
    %cst_12 = arith.constant -5.000000e-01 : f32
    %21 = vector.broadcast %cst_12 : f32 to vector<32x8xf32>
    %22 = arith.mulf %21, %20 : vector<32x8xf32>
    %cst_13 = arith.constant -7.35150814 : f32
    %23 = vector.broadcast %cst_13 : f32 to vector<32x8xf32>
    %24 = arith.addf %22, %23 : vector<32x8xf32>
    %25 = vector.broadcast %3 : vector<1x8xf32> to vector<32x8xf32>
    %26 = arith.addf %24, %25 : vector<32x8xf32>
    %cst_14 = arith.constant dense<0xFF800000> : vector<32xf32>
    %27 = vector.multi_reduction <maximumf>, %26, %cst_14 [1] : vector<32x8xf32> to vector<32xf32>
    %28 = vector.shape_cast %27 : vector<32xf32> to vector<32x1xf32>
    %29 = vector.broadcast %28 : vector<32x1xf32> to vector<32x8xf32>
    %30 = arith.subf %26, %29 : vector<32x8xf32>
    %31 = math.exp %30 : vector<32x8xf32>
    %cst_15 = arith.constant dense<0.000000e+00> : vector<32xf32>
    %32 = vector.multi_reduction <add>, %31, %cst_15 [1] : vector<32x8xf32> to vector<32xf32>
    %33 = vector.shape_cast %32 : vector<32xf32> to vector<32x1xf32>
    %34 = vector.broadcast %33 : vector<32x1xf32> to vector<32x8xf32>
    %35 = arith.divf %31, %34 : vector<32x8xf32>
    %cst_16 = arith.constant 1.000000e+00 : f32
    %36 = vector.broadcast %cst_16 : f32 to vector<32x1xf32>
    %cst_17 = arith.constant dense<0.000000e+00> : vector<8x1xf32>
    %37 = tpu.matmul %35, %36, %cst_17 {dimension_numbers = #tpu.dot_dimension_numbers<[0], [0], [1], [1], [0, 1, 1, 1], [], []>} : vector<32x8xf32>, vector<32x1xf32>, vector<8x1xf32> -> vector<8x1xf32>
    %cst_18 = arith.constant dense<0.000000e+00> : vector<8xf32>
    %38 = vector.multi_reduction <add>, %35, %cst_18 [0] : vector<32x8xf32> to vector<8xf32>
    %39 = vector.shape_cast %38 : vector<8xf32> to vector<1x8xf32>
    %cst_19 = arith.constant dense<0.000000e+00> : vector<1xf32>
    %40 = vector.multi_reduction <add>, %39, %cst_19 [1] : vector<1x8xf32> to vector<1xf32>
    %41 = vector.shape_cast %40 : vector<1xf32> to vector<1x1xf32>
    %42 = vector.broadcast %41 : vector<1x1xf32> to vector<1x8xf32>
    %43 = arith.divf %39, %42 : vector<1x8xf32>
    %c0_20 = arith.constant 0 : index
    %c0_21 = arith.constant 0 : index
    %44 = vector.load %arg4[%c0_20, %c0_21] : memref<1x8xf32, #tpu.memory_space<vmem>>, vector<1x8xf32>
    tpu.vector_store %arg4[%c0_20, %c0_21], %43 {strides = array<i32>} : memref<1x8xf32, #tpu.memory_space<vmem>>, vector<1x8xf32>,
    %cst_22 = arith.constant dense<0.000000e+00> : vector<8x8xf32>
    %45 = tpu.matmul %35, %0, %cst_22 {dimension_numbers = #tpu.dot_dimension_numbers<[0], [0], [1], [1], [0, 1, 1, 1], [], []>} : vector<32x8xf32>, vector<32x8xf32>, vector<8x8xf32> -> vector<8x8xf32>
    %46 = arith.mulf %0, %0 : vector<32x8xf32>
    %cst_23 = arith.constant dense<0.000000e+00> : vector<8x8xf32>
    %47 = tpu.matmul %35, %46, %cst_23 {dimension_numbers = #tpu.dot_dimension_numbers<[0], [0], [1], [1], [0, 1, 1, 1], [], []>} : vector<32x8xf32>, vector<32x8xf32>, vector<8x8xf32> -> vector<8x8xf32>
    %48 = vector.broadcast %37 : vector<8x1xf32> to vector<8x8xf32>
    %49 = arith.divf %45, %48 : vector<8x8xf32>
    %50 = vector.broadcast %37 : vector<8x1xf32> to vector<8x8xf32>
    %51 = arith.divf %47, %50 : vector<8x8xf32>
    %52 = arith.mulf %49, %49 : vector<8x8xf32>
    %53 = arith.subf %51, %52 : vector<8x8xf32>
    %cst_24 = arith.constant 0.000000e+00 : f32
    %54 = vector.broadcast %cst_24 : f32 to vector<8x8xf32>
    %55 = arith.maximumf %53, %54 : vector<8x8xf32>
    %c0_25 = arith.constant 0 : index
    %c0_26 = arith.constant 0 : index
    %56 = vector.load %arg5[%c0_25, %c0_26] : memref<8x8xf32, #tpu.memory_space<vmem>>, vector<8x8xf32>
    tpu.vector_store %arg5[%c0_25, %c0_26], %49 {strides = array<i32>} : memref<8x8xf32, #tpu.memory_space<vmem>>, vector<8x8xf32>,
    %cst_27 = arith.constant 9.99999993E-9 : f32
    %57 = vector.broadcast %cst_27 : f32 to vector<8x8xf32>
    %58 = arith.addf %55, %57 : vector<8x8xf32>
    %59 = math.log %58 : vector<8x8xf32>
    %c0_28 = arith.constant 0 : index
    %c0_29 = arith.constant 0 : index
    %60 = vector.load %arg6[%c0_28, %c0_29] : memref<8x8xf32, #tpu.memory_space<vmem>>, vector<8x8xf32>
    tpu.vector_store %arg6[%c0_28, %c0_29], %59 {strides = array<i32>} : memref<8x8xf32, #tpu.memory_space<vmem>>, vector<8x8xf32>,
    return
  }
}

module attributes {stable_mosaic.version = 11 : i64} {
  func.func @_gmm_loglik_kernel(%arg0: memref<32x8xf32, #tpu.memory_space<vmem>>, %arg1: memref<8x8xf32, #tpu.memory_space<vmem>>, %arg2: memref<8x8xf32, #tpu.memory_space<vmem>>, %arg3: memref<1x8xf32, #tpu.memory_space<vmem>>, %arg4: memref<32x8xf32, #tpu.memory_space<vmem>>) attributes {dimension_semantics = [], scalar_prefetch = 0 : i64, scratch_operands = 0 : i64, tpu.core_type = #tpu.core_type<tc>} {
    %c0 = arith.constant 0 : index
    %c0_0 = arith.constant 0 : index
    %0 = vector.load %arg0[%c0, %c0_0] : memref<32x8xf32, #tpu.memory_space<vmem>>, vector<32x8xf32>
    %c0_1 = arith.constant 0 : index
    %c0_2 = arith.constant 0 : index
    %1 = vector.load %arg1[%c0_1, %c0_2] : memref<8x8xf32, #tpu.memory_space<vmem>>, vector<8x8xf32>
    %c0_3 = arith.constant 0 : index
    %c0_4 = arith.constant 0 : index
    %2 = vector.load %arg2[%c0_3, %c0_4] : memref<8x8xf32, #tpu.memory_space<vmem>>, vector<8x8xf32>
    %c0_5 = arith.constant 0 : index
    %c0_6 = arith.constant 0 : index
    %3 = vector.load %arg3[%c0_5, %c0_6] : memref<1x8xf32, #tpu.memory_space<vmem>>, vector<1x8xf32>
    %cst = arith.constant 0.000000e+00 : f32
    %4 = vector.broadcast %cst : f32 to vector<8x8xf32>
    %5 = arith.subf %4, %2 : vector<8x8xf32>
    %6 = math.exp %5 : vector<8x8xf32>
    %7 = arith.mulf %0, %0 : vector<32x8xf32>
    %cst_7 = arith.constant dense<0.000000e+00> : vector<32x8xf32>
    %8 = tpu.matmul %7, %6, %cst_7 {dimension_numbers = #tpu.dot_dimension_numbers<[1], [1], [0], [0], [0, 0, 1, 0], [], []>} : vector<32x8xf32>, vector<8x8xf32>, vector<32x8xf32> -> vector<32x8xf32>
    %9 = arith.mulf %1, %6 : vector<8x8xf32>
    %cst_8 = arith.constant dense<0.000000e+00> : vector<32x8xf32>
    %10 = tpu.matmul %0, %9, %cst_8 {dimension_numbers = #tpu.dot_dimension_numbers<[1], [1], [0], [0], [0, 0, 1, 0], [], []>} : vector<32x8xf32>, vector<8x8xf32>, vector<32x8xf32> -> vector<32x8xf32>
    %cst_9 = arith.constant 1.000000e+00 : f32
    %11 = vector.broadcast %cst_9 : f32 to vector<1x8xf32>
    %12 = arith.mulf %1, %1 : vector<8x8xf32>
    %13 = arith.mulf %12, %6 : vector<8x8xf32>
    %14 = arith.addf %2, %13 : vector<8x8xf32>
    %cst_10 = arith.constant dense<0.000000e+00> : vector<1x8xf32>
    %15 = tpu.matmul %11, %14, %cst_10 {dimension_numbers = #tpu.dot_dimension_numbers<[1], [1], [0], [0], [0, 0, 1, 0], [], []>} : vector<1x8xf32>, vector<8x8xf32>, vector<1x8xf32> -> vector<1x8xf32>
    %cst_11 = arith.constant 2.000000e+00 : f32
    %16 = vector.broadcast %cst_11 : f32 to vector<32x8xf32>
    %17 = arith.mulf %16, %10 : vector<32x8xf32>
    %18 = arith.subf %8, %17 : vector<32x8xf32>
    %19 = vector.broadcast %15 : vector<1x8xf32> to vector<32x8xf32>
    %20 = arith.addf %18, %19 : vector<32x8xf32>
    %cst_12 = arith.constant -5.000000e-01 : f32
    %21 = vector.broadcast %cst_12 : f32 to vector<32x8xf32>
    %22 = arith.mulf %21, %20 : vector<32x8xf32>
    %cst_13 = arith.constant -7.35150814 : f32
    %23 = vector.broadcast %cst_13 : f32 to vector<32x8xf32>
    %24 = arith.addf %22, %23 : vector<32x8xf32>
    %25 = vector.broadcast %3 : vector<1x8xf32> to vector<32x8xf32>
    %26 = arith.addf %24, %25 : vector<32x8xf32>
    %c0_14 = arith.constant 0 : index
    %c0_15 = arith.constant 0 : index
    %27 = vector.load %arg4[%c0_14, %c0_15] : memref<32x8xf32, #tpu.memory_space<vmem>>, vector<32x8xf32>
    tpu.vector_store %arg4[%c0_14, %c0_15], %26 {strides = array<i32>} : memref<32x8xf32, #tpu.memory_space<vmem>>, vector<32x8xf32>,
    return
  }
}

module attributes {stable_mosaic.version = 11 : i64} {
  func.func @_graph_bce_kernel(%arg0: memref<32x8xf32, #tpu.memory_space<vmem>>, %arg1: memref<32x32xf32, #tpu.memory_space<vmem>>, %arg2: memref<1x1xf32, #tpu.memory_space<vmem>>) attributes {dimension_semantics = [], scalar_prefetch = 0 : i64, scratch_operands = 0 : i64, tpu.core_type = #tpu.core_type<tc>} {
    %c0 = arith.constant 0 : index
    %c0_0 = arith.constant 0 : index
    %0 = vector.load %arg0[%c0, %c0_0] : memref<32x8xf32, #tpu.memory_space<vmem>>, vector<32x8xf32>
    %c0_1 = arith.constant 0 : index
    %c0_2 = arith.constant 0 : index
    %1 = vector.load %arg1[%c0_1, %c0_2] : memref<32x32xf32, #tpu.memory_space<vmem>>, vector<32x32xf32>
    %cst = arith.constant dense<0.000000e+00> : vector<32x32xf32>
    %2 = tpu.matmul %0, %0, %cst {dimension_numbers = #tpu.dot_dimension_numbers<[1], [1], [0], [0], [0, 0, 1, 0], [], []>} : vector<32x8xf32>, vector<32x8xf32>, vector<32x32xf32> -> vector<32x32xf32>
    %cst_3 = arith.constant 0.000000e+00 : f32
    %3 = vector.broadcast %cst_3 : f32 to vector<32x32xf32>
    %4 = arith.subf %3, %2 : vector<32x32xf32>
    %cst_4 = arith.constant 0.000000e+00 : f32
    %5 = vector.broadcast %cst_4 : f32 to vector<32x32xf32>
    %6 = arith.maximumf %4, %5 : vector<32x32xf32>
    %7 = math.absf %4 : vector<32x32xf32>
    %cst_5 = arith.constant 0.000000e+00 : f32
    %8 = vector.broadcast %cst_5 : f32 to vector<32x32xf32>
    %9 = arith.subf %8, %7 : vector<32x32xf32>
    %10 = math.exp %9 : vector<32x32xf32>
    %cst_6 = arith.constant 1.000000e+00 : f32
    %11 = vector.broadcast %cst_6 : f32 to vector<32x32xf32>
    %12 = arith.addf %11, %10 : vector<32x32xf32>
    %13 = math.log %12 : vector<32x32xf32>
    %14 = arith.addf %6, %13 : vector<32x32xf32>
    %cst_7 = arith.constant 0.000000e+00 : f32
    %15 = vector.broadcast %cst_7 : f32 to vector<32x32xf32>
    %16 = arith.subf %15, %14 : vector<32x32xf32>
    %cst_8 = arith.constant -1.000000e+02 : f32
    %17 = vector.broadcast %cst_8 : f32 to vector<32x32xf32>
    %18 = arith.maximumf %16, %17 : vector<32x32xf32>
    %cst_9 = arith.constant 0.000000e+00 : f32
    %19 = vector.broadcast %cst_9 : f32 to vector<32x32xf32>
    %20 = arith.maximumf %2, %19 : vector<32x32xf32>
    %21 = math.absf %2 : vector<32x32xf32>
    %cst_10 = arith.constant 0.000000e+00 : f32
    %22 = vector.broadcast %cst_10 : f32 to vector<32x32xf32>
    %23 = arith.subf %22, %21 : vector<32x32xf32>
    %24 = math.exp %23 : vector<32x32xf32>
    %cst_11 = arith.constant 1.000000e+00 : f32
    %25 = vector.broadcast %cst_11 : f32 to vector<32x32xf32>
    %26 = arith.addf %25, %24 : vector<32x32xf32>
    %27 = math.log %26 : vector<32x32xf32>
    %28 = arith.addf %20, %27 : vector<32x32xf32>
    %cst_12 = arith.constant 0.000000e+00 : f32
    %29 = vector.broadcast %cst_12 : f32 to vector<32x32xf32>
    %30 = arith.subf %29, %28 : vector<32x32xf32>
    %cst_13 = arith.constant -1.000000e+02 : f32
    %31 = vector.broadcast %cst_13 : f32 to vector<32x32xf32>
    %32 = arith.maximumf %30, %31 : vector<32x32xf32>
    %cst_14 = arith.constant dense<0.000000e+00> : vector<32xf32>
    %33 = vector.multi_reduction <add>, %1, %cst_14 [1] : vector<32x32xf32> to vector<32xf32>
    %34 = vector.shape_cast %33 : vector<32xf32> to vector<32x1xf32>
    %cst_15 = arith.constant dense<0.000000e+00> : vector<1xf32>
    %35 = vector.multi_reduction <add>, %34, %cst_15 [0] : vector<32x1xf32> to vector<1xf32>
    %36 = vector.shape_cast %35 : vector<1xf32> to vector<1x1xf32>
    %cst_16 = arith.constant 1.024000e+03 : f32
    %37 = vector.broadcast %cst_16 : f32 to vector<1x1xf32>
    %38 = arith.subf %37, %36 : vector<1x1xf32>
    %39 = arith.divf %38, %36 : vector<1x1xf32>
    %cst_17 = arith.constant 1.000000e+00 : f32
    %40 = vector.broadcast %cst_17 : f32 to vector<32x32xf32>
    %41 = arith.cmpf oeq, %1, %40 : vector<32x32xf32>
    %cst_18 = arith.constant 1.000000e+00 : f32
    %42 = vector.shape_cast %39 : vector<1x1xf32> to vector<1x1xf32>
    %43 = vector.broadcast %42 : vector<1x1xf32> to vector<32x32xf32>
    %44 = vector.broadcast %cst_18 : f32 to vector<32x32xf32>
    %45 = arith.select %41, %43, %44 : vector<32x32xi1>, vector<32x32xf32>
    %cst_19 = arith.constant 0.000000e+00 : f32
    %46 = vector.broadcast %cst_19 : f32 to vector<32x32xf32>
    %47 = arith.subf %46, %45 : vector<32x32xf32>
    %48 = arith.mulf %1, %18 : vector<32x32xf32>
    %cst_20 = arith.constant 1.000000e+00 : f32
    %49 = vector.broadcast %cst_20 : f32 to vector<32x32xf32>
    %50 = arith.subf %49, %1 : vector<32x32xf32>
    %51 = arith.mulf %50, %32 : vector<32x32xf32>
    %52 = arith.addf %48, %51 : vector<32x32xf32>
    %53 = arith.mulf %47, %52 : vector<32x32xf32>
    %cst_21 = arith.constant dense<0.000000e+00> : vector<32xf32>
    %54 = vector.multi_reduction <add>, %53, %cst_21 [1] : vector<32x32xf32> to vector<32xf32>
    %55 = vector.shape_cast %54 : vector<32xf32> to vector<32x1xf32>
    %cst_22 = arith.constant dense<0.000000e+00> : vector<1xf32>
    %56 = vector.multi_reduction <add>, %55, %cst_22 [0] : vector<32x1xf32> to vector<1xf32>
    %57 = vector.shape_cast %56 : vector<1xf32> to vector<1x1xf32>
    %cst_23 = arith.constant 1.024000e+03 : f32
    %58 = vector.broadcast %cst_23 : f32 to vector<1x1xf32>
    %59 = arith.divf %57, %58 : vector<1x1xf32>
    %c0_24 = arith.constant 0 : index
    %c0_25 = arith.constant 0 : index
    %60 = vector.load %arg2[%c0_24, %c0_25] : memref<1x1xf32, #tpu.memory_space<vmem>>, vector<1x1xf32>
    tpu.vector_store %arg2[%c0_24, %c0_25], %59 {strides = array<i32>} : memref<1x1xf32, #tpu.memory_space<vmem>>, vector<1x1xf32>,
    return
  }
}

module attributes {stable_mosaic.version = 11 : i64} {
  func.func @_encoder_kernel(%arg0: i32, %arg1: i32, %arg2: memref<8x64xf32, #tpu.memory_space<vmem>>, %arg3: memref<64x32xf32, #tpu.memory_space<vmem>>, %arg4: memref<1x32xf32, #tpu.memory_space<vmem>>, %arg5: memref<32x32xf32, #tpu.memory_space<vmem>>, %arg6: memref<1x32xf32, #tpu.memory_space<vmem>>, %arg7: memref<8x32xf32, #tpu.memory_space<vmem>>, %arg8: memref<8x32xf32, #tpu.memory_space<vmem>>) attributes {dimension_semantics = [#tpu.dimension_semantics<parallel>, #tpu.dimension_semantics<arbitrary>], iteration_bounds = array<i64: 1, 1>, scalar_prefetch = 0 : i64, scratch_operands = 1 : i64, tpu.core_type = #tpu.core_type<tc>, window_params = [{transform_indices = @transform_0, window_bounds = array<i64: 8, 64>}, {transform_indices = @transform_1, window_bounds = array<i64: 64, 32>}, {pipeline_mode = #tpu.pipeline_mode<synchronous>, transform_indices = @transform_2, window_bounds = array<i64: 1, 32>}, {pipeline_mode = #tpu.pipeline_mode<synchronous>, transform_indices = @transform_3, window_bounds = array<i64: 32, 32>}, {pipeline_mode = #tpu.pipeline_mode<synchronous>, transform_indices = @transform_4, window_bounds = array<i64: 1, 32>}, {transform_indices = @transform_5, window_bounds = array<i64: 8, 32>}]} {
    %c0_i32 = arith.constant 0 : i32
    %0 = arith.cmpi eq, %arg1, %c0_i32 : i32
    %1 = arith.extui %0 : i1 to i32
    %c0_i32_0 = arith.constant 0 : i32
    %2 = arith.cmpi ne, %1, %c0_i32_0 : i32
    scf.if %2 {
      %cst_10 = arith.constant 0.000000e+00 : f32
      %12 = vector.broadcast %cst_10 : f32 to vector<8x32xf32>
      %c0_11 = arith.constant 0 : index
      %c0_12 = arith.constant 0 : index
      %13 = vector.load %arg8[%c0_11, %c0_12] : memref<8x32xf32, #tpu.memory_space<vmem>>, vector<8x32xf32>
      tpu.vector_store %arg8[%c0_11, %c0_12], %12 {strides = array<i32>} : memref<8x32xf32, #tpu.memory_space<vmem>>, vector<8x32xf32>,
    } else {
    }
    %c0 = arith.constant 0 : index
    %c0_1 = arith.constant 0 : index
    %3 = vector.load %arg8[%c0, %c0_1] : memref<8x32xf32, #tpu.memory_space<vmem>>, vector<8x32xf32>
    %c0_2 = arith.constant 0 : index
    %c0_3 = arith.constant 0 : index
    %4 = vector.load %arg2[%c0_2, %c0_3] : memref<8x64xf32, #tpu.memory_space<vmem>>, vector<8x64xf32>
    %c0_4 = arith.constant 0 : index
    %c0_5 = arith.constant 0 : index
    %5 = vector.load %arg3[%c0_4, %c0_5] : memref<64x32xf32, #tpu.memory_space<vmem>>, vector<64x32xf32>
    %cst = arith.constant dense<0.000000e+00> : vector<8x32xf32>
    %6 = tpu.matmul %4, %5, %cst {dimension_numbers = #tpu.dot_dimension_numbers<[1], [0], [0], [1], [0, 0, 1, 1], [], []>} : vector<8x64xf32>, vector<64x32xf32>, vector<8x32xf32> -> vector<8x32xf32>
    %7 = arith.addf %3, %6 : vector<8x32xf32>
    %c0_6 = arith.constant 0 : index
    %c0_7 = arith.constant 0 : index
    %8 = vector.load %arg8[%c0_6, %c0_7] : memref<8x32xf32, #tpu.memory_space<vmem>>, vector<8x32xf32>
    tpu.vector_store %arg8[%c0_6, %c0_7], %7 {strides = array<i32>} : memref<8x32xf32, #tpu.memory_space<vmem>>, vector<8x32xf32>,
    %c0_i32_8 = arith.constant 0 : i32
    %9 = arith.cmpi eq, %arg1, %c0_i32_8 : i32
    %10 = arith.extui %9 : i1 to i32
    %c0_i32_9 = arith.constant 0 : i32
    %11 = arith.cmpi ne, %10, %c0_i32_9 : i32
    scf.if %11 {
      %c0_10 = arith.constant 0 : index
      %c0_11 = arith.constant 0 : index
      %12 = vector.load %arg8[%c0_10, %c0_11] : memref<8x32xf32, #tpu.memory_space<vmem>>, vector<8x32xf32>
      %c0_12 = arith.constant 0 : index
      %c0_13 = arith.constant 0 : index
      %13 = vector.load %arg4[%c0_12, %c0_13] : memref<1x32xf32, #tpu.memory_space<vmem>>, vector<1x32xf32>
      %14 = vector.broadcast %13 : vector<1x32xf32> to vector<8x32xf32>
      %15 = arith.addf %12, %14 : vector<8x32xf32>
      %cst_14 = arith.constant 0.999994993 : f32
      %16 = vector.broadcast %cst_14 : f32 to vector<8x32xf32>
      %17 = arith.mulf %15, %16 : vector<8x32xf32>
      %18 = math.tanh %17 : vector<8x32xf32>
      %c0_15 = arith.constant 0 : index
      %c0_16 = arith.constant 0 : index
      %19 = vector.load %arg5[%c0_15, %c0_16] : memref<32x32xf32, #tpu.memory_space<vmem>>, vector<32x32xf32>
      %cst_17 = arith.constant dense<0.000000e+00> : vector<8x32xf32>
      %20 = tpu.matmul %18, %19, %cst_17 {dimension_numbers = #tpu.dot_dimension_numbers<[1], [0], [0], [1], [0, 0, 1, 1], [], []>} : vector<8x32xf32>, vector<32x32xf32>, vector<8x32xf32> -> vector<8x32xf32>
      %c0_18 = arith.constant 0 : index
      %c0_19 = arith.constant 0 : index
      %21 = vector.load %arg6[%c0_18, %c0_19] : memref<1x32xf32, #tpu.memory_space<vmem>>, vector<1x32xf32>
      %22 = vector.broadcast %21 : vector<1x32xf32> to vector<8x32xf32>
      %23 = arith.addf %20, %22 : vector<8x32xf32>
      %cst_20 = arith.constant 0.999994993 : f32
      %24 = vector.broadcast %cst_20 : f32 to vector<8x32xf32>
      %25 = arith.mulf %23, %24 : vector<8x32xf32>
      %26 = math.tanh %25 : vector<8x32xf32>
      %c0_21 = arith.constant 0 : index
      %c0_22 = arith.constant 0 : index
      %27 = vector.load %arg7[%c0_21, %c0_22] : memref<8x32xf32, #tpu.memory_space<vmem>>, vector<8x32xf32>
      tpu.vector_store %arg7[%c0_21, %c0_22], %26 {strides = array<i32>} : memref<8x32xf32, #tpu.memory_space<vmem>>, vector<8x32xf32>,
    } else {
    }
    return
  }
  func.func @transform_0(%arg0: i32, %arg1: i32) -> (i32, i32) {
    %c0_i32 = arith.constant 0 : i32
    return %arg0, %arg1 : i32, i32
  }
  func.func @transform_1(%arg0: i32, %arg1: i32) -> (i32, i32) {
    %c0_i32 = arith.constant 0 : i32
    %c0_i32_0 = arith.constant 0 : i32
    return %arg1, %c0_i32 : i32, i32
  }
  func.func @transform_2(%arg0: i32, %arg1: i32) -> (i32, i32) {
    %c0_i32 = arith.constant 0 : i32
    %c0_i32_0 = arith.constant 0 : i32
    %c0_i32_1 = arith.constant 0 : i32
    return %c0_i32, %c0_i32_0 : i32, i32
  }
  func.func @transform_3(%arg0: i32, %arg1: i32) -> (i32, i32) {
    %c0_i32 = arith.constant 0 : i32
    %c0_i32_0 = arith.constant 0 : i32
    %c0_i32_1 = arith.constant 0 : i32
    return %c0_i32, %c0_i32_0 : i32, i32
  }
  func.func @transform_4(%arg0: i32, %arg1: i32) -> (i32, i32) {
    %c0_i32 = arith.constant 0 : i32
    %c0_i32_0 = arith.constant 0 : i32
    %c0_i32_1 = arith.constant 0 : i32
    return %c0_i32, %c0_i32_0 : i32, i32
  }
  func.func @transform_5(%arg0: i32, %arg1: i32) -> (i32, i32) {
    %c0_i32 = arith.constant 0 : i32
    %c0_i32_0 = arith.constant 0 : i32
    return %arg0, %c0_i32 : i32, i32
  }
}

module attributes {stable_mosaic.version = 11 : i64} {
  func.func @_heads_kernel(%arg0: memref<8x32xf32, #tpu.memory_space<vmem>>, %arg1: memref<1x32xf32, #tpu.memory_space<vmem>>, %arg2: memref<32x32xf32, #tpu.memory_space<vmem>>, %arg3: memref<1x32xf32, #tpu.memory_space<vmem>>, %arg4: memref<32x16xf32, #tpu.memory_space<vmem>>, %arg5: memref<1x16xf32, #tpu.memory_space<vmem>>, %arg6: memref<32x32xf32, #tpu.memory_space<vmem>>, %arg7: memref<8x32xf32, #tpu.memory_space<vmem>>, %arg8: memref<1x32xf32, #tpu.memory_space<vmem>>, %arg9: memref<32x32xf32, #tpu.memory_space<vmem>>, %arg10: memref<1x32xf32, #tpu.memory_space<vmem>>, %arg11: memref<32x16xf32, #tpu.memory_space<vmem>>, %arg12: memref<1x16xf32, #tpu.memory_space<vmem>>, %arg13: memref<1x16xf32, #tpu.memory_space<vmem>>, %arg14: memref<8x16xf32, #tpu.memory_space<vmem>>) attributes {dimension_semantics = [], scalar_prefetch = 0 : i64, scratch_operands = 0 : i64, tpu.core_type = #tpu.core_type<tc>} {
    %c0 = arith.constant 0 : index
    %c0_0 = arith.constant 0 : index
    %0 = vector.load %arg0[%c0, %c0_0] : memref<8x32xf32, #tpu.memory_space<vmem>>, vector<8x32xf32>
    %c0_1 = arith.constant 0 : index
    %c0_2 = arith.constant 0 : index
    %1 = vector.load %arg1[%c0_1, %c0_2] : memref<1x32xf32, #tpu.memory_space<vmem>>, vector<1x32xf32>
    %2 = vector.broadcast %1 : vector<1x32xf32> to vector<8x32xf32>
    %3 = arith.mulf %0, %2 : vector<8x32xf32>
    %cst = arith.constant dense<0.000000e+00> : vector<8xf32>
    %4 = vector.multi_reduction <add>, %3, %cst [1] : vector<8x32xf32> to vector<8xf32>
    %5 = vector.shape_cast %4 : vector<8xf32> to vector<8x1xf32>
    %cst_3 = arith.constant dense<0xFF800000> : vector<1xf32>
    %6 = vector.multi_reduction <maximumf>, %5, %cst_3 [0] : vector<8x1xf32> to vector<1xf32>
    %7 = vector.shape_cast %6 : vector<1xf32> to vector<1x1xf32>
    %8 = vector.broadcast %7 : vector<1x1xf32> to vector<8x1xf32>
    %9 = arith.subf %5, %8 : vector<8x1xf32>
    %10 = math.exp %9 : vector<8x1xf32>
    %cst_4 = arith.constant dense<0.000000e+00> : vector<1xf32>
    %11 = vector.multi_reduction <add>, %10, %cst_4 [0] : vector<8x1xf32> to vector<1xf32>
    %12 = vector.shape_cast %11 : vector<1xf32> to vector<1x1xf32>
    %13 = vector.broadcast %12 : vector<1x1xf32> to vector<8x1xf32>
    %14 = arith.divf %10, %13 : vector<8x1xf32>
    %15 = vector.broadcast %14 : vector<8x1xf32> to vector<8x32xf32>
    %16 = arith.mulf %15, %0 : vector<8x32xf32>
    %cst_5 = arith.constant dense<0.000000e+00> : vector<32xf32>
    %17 = vector.multi_reduction <add>, %16, %cst_5 [0] : vector<8x32xf32> to vector<32xf32>
    %18 = vector.shape_cast %17 : vector<32xf32> to vector<1x32xf32>
    %c0_6 = arith.constant 0 : index
    %c0_7 = arith.constant 0 : index
    %19 = vector.load %arg2[%c0_6, %c0_7] : memref<32x32xf32, #tpu.memory_space<vmem>>, vector<32x32xf32>
    %cst_8 = arith.constant dense<0.000000e+00> : vector<1x32xf32>
    %20 = tpu.matmul %18, %19, %cst_8 {dimension_numbers = #tpu.dot_dimension_numbers<[1], [0], [0], [1], [0, 0, 1, 1], [], []>} : vector<1x32xf32>, vector<32x32xf32>, vector<1x32xf32> -> vector<1x32xf32>
    %c0_9 = arith.constant 0 : index
    %c0_10 = arith.constant 0 : index
    %21 = vector.load %arg3[%c0_9, %c0_10] : memref<1x32xf32, #tpu.memory_space<vmem>>, vector<1x32xf32>
    %22 = arith.addf %20, %21 : vector<1x32xf32>
    %23 = math.tanh %22 : vector<1x32xf32>
    %c0_11 = arith.constant 0 : index
    %c0_12 = arith.constant 0 : index
    %24 = vector.load %arg4[%c0_11, %c0_12] : memref<32x16xf32, #tpu.memory_space<vmem>>, vector<32x16xf32>
    %cst_13 = arith.constant dense<0.000000e+00> : vector<1x16xf32>
    %25 = tpu.matmul %23, %24, %cst_13 {dimension_numbers = #tpu.dot_dimension_numbers<[1], [0], [0], [1], [0, 0, 1, 1], [], []>} : vector<1x32xf32>, vector<32x16xf32>, vector<1x16xf32> -> vector<1x16xf32>
    %c0_14 = arith.constant 0 : index
    %c0_15 = arith.constant 0 : index
    %26 = vector.load %arg5[%c0_14, %c0_15] : memref<1x16xf32, #tpu.memory_space<vmem>>, vector<1x16xf32>
    %27 = arith.addf %25, %26 : vector<1x16xf32>
    %c0_16 = arith.constant 0 : index
    %c0_17 = arith.constant 0 : index
    %28 = vector.load %arg13[%c0_16, %c0_17] : memref<1x16xf32, #tpu.memory_space<vmem>>, vector<1x16xf32>
    tpu.vector_store %arg13[%c0_16, %c0_17], %27 {strides = array<i32>} : memref<1x16xf32, #tpu.memory_space<vmem>>, vector<1x16xf32>,
    %29 = vector.extract_strided_slice %27 {offsets = [0, 0], sizes = [1, 8], strides = [1, 1]} : vector<1x16xf32> to vector<1x8xf32>
    %c0_18 = arith.constant 0 : index
    %c0_19 = arith.constant 0 : index
    %30 = vector.load %arg6[%c0_18, %c0_19] : memref<32x32xf32, #tpu.memory_space<vmem>>, vector<32x32xf32>
    %cst_20 = arith.constant dense<0.000000e+00> : vector<8x32xf32>
    %31 = tpu.matmul %0, %30, %cst_20 {dimension_numbers = #tpu.dot_dimension_numbers<[1], [0], [0], [1], [0, 0, 1, 1], [], []>} : vector<8x32xf32>, vector<32x32xf32>, vector<8x32xf32> -> vector<8x32xf32>
    %c0_21 = arith.constant 0 : index
    %c0_22 = arith.constant 0 : index
    %32 = vector.load %arg7[%c0_21, %c0_22] : memref<8x32xf32, #tpu.memory_space<vmem>>, vector<8x32xf32>
    %cst_23 = arith.constant dense<0.000000e+00> : vector<1x32xf32>
    %33 = tpu.matmul %29, %32, %cst_23 {dimension_numbers = #tpu.dot_dimension_numbers<[1], [0], [0], [1], [0, 0, 1, 1], [], []>} : vector<1x8xf32>, vector<8x32xf32>, vector<1x32xf32> -> vector<1x32xf32>
    %34 = vector.broadcast %33 : vector<1x32xf32> to vector<8x32xf32>
    %35 = arith.addf %31, %34 : vector<8x32xf32>
    %c0_24 = arith.constant 0 : index
    %c0_25 = arith.constant 0 : index
    %36 = vector.load %arg8[%c0_24, %c0_25] : memref<1x32xf32, #tpu.memory_space<vmem>>, vector<1x32xf32>
    %37 = vector.broadcast %36 : vector<1x32xf32> to vector<8x32xf32>
    %38 = arith.addf %35, %37 : vector<8x32xf32>
    %39 = math.tanh %38 : vector<8x32xf32>
    %c0_26 = arith.constant 0 : index
    %c0_27 = arith.constant 0 : index
    %40 = vector.load %arg9[%c0_26, %c0_27] : memref<32x32xf32, #tpu.memory_space<vmem>>, vector<32x32xf32>
    %cst_28 = arith.constant dense<0.000000e+00> : vector<8x32xf32>
    %41 = tpu.matmul %39, %40, %cst_28 {dimension_numbers = #tpu.dot_dimension_numbers<[1], [0], [0], [1], [0, 0, 1, 1], [], []>} : vector<8x32xf32>, vector<32x32xf32>, vector<8x32xf32> -> vector<8x32xf32>
    %c0_29 = arith.constant 0 : index
    %c0_30 = arith.constant 0 : index
    %42 = vector.load %arg10[%c0_29, %c0_30] : memref<1x32xf32, #tpu.memory_space<vmem>>, vector<1x32xf32>
    %43 = vector.broadcast %42 : vector<1x32xf32> to vector<8x32xf32>
    %44 = arith.addf %41, %43 : vector<8x32xf32>
    %45 = math.tanh %44 : vector<8x32xf32>
    %c0_31 = arith.constant 0 : index
    %c0_32 = arith.constant 0 : index
    %46 = vector.load %arg11[%c0_31, %c0_32] : memref<32x16xf32, #tpu.memory_space<vmem>>, vector<32x16xf32>
    %cst_33 = arith.constant dense<0.000000e+00> : vector<8x16xf32>
    %47 = tpu.matmul %45, %46, %cst_33 {dimension_numbers = #tpu.dot_dimension_numbers<[1], [0], [0], [1], [0, 0, 1, 1], [], []>} : vector<8x32xf32>, vector<32x16xf32>, vector<8x16xf32> -> vector<8x16xf32>
    %c0_34 = arith.constant 0 : index
    %c0_35 = arith.constant 0 : index
    %48 = vector.load %arg12[%c0_34, %c0_35] : memref<1x16xf32, #tpu.memory_space<vmem>>, vector<1x16xf32>
    %49 = vector.broadcast %48 : vector<1x16xf32> to vector<8x16xf32>
    %50 = arith.addf %47, %49 : vector<8x16xf32>
    %c0_36 = arith.constant 0 : index
    %c0_37 = arith.constant 0 : index
    %51 = vector.load %arg14[%c0_36, %c0_37] : memref<8x16xf32, #tpu.memory_space<vmem>>, vector<8x16xf32>
    tpu.vector_store %arg14[%c0_36, %c0_37], %50 {strides = array<i32>} : memref<8x16xf32, #tpu.memory_space<vmem>>, vector<8x16xf32>,
    return
  }
}

module attributes {stable_mosaic.version = 11 : i64} {
  func.func @_bow_kernel(%arg0: memref<32x8xf32, #tpu.memory_space<vmem>>, %arg1: memref<32x64xf32, #tpu.memory_space<vmem>>, %arg2: memref<8x8xf32, #tpu.memory_space<vmem>>, %arg3: memref<8x64xf32, #tpu.memory_space<vmem>>, %arg4: memref<1x1xf32, #tpu.memory_space<vmem>>) attributes {dimension_semantics = [], scalar_prefetch = 0 : i64, scratch_operands = 0 : i64, tpu.core_type = #tpu.core_type<tc>} {
    %c0 = arith.constant 0 : index
    %c0_0 = arith.constant 0 : index
    %0 = vector.load %arg0[%c0, %c0_0] : memref<32x8xf32, #tpu.memory_space<vmem>>, vector<32x8xf32>
    %1 = arith.mulf %0, %0 : vector<32x8xf32>
    %cst = arith.constant dense<0.000000e+00> : vector<32xf32>
    %2 = vector.multi_reduction <add>, %1, %cst [1] : vector<32x8xf32> to vector<32xf32>
    %3 = vector.shape_cast %2 : vector<32xf32> to vector<32x1xf32>
    %4 = math.sqrt %3 : vector<32x1xf32>
    %cst_1 = arith.constant 9.99999996E-13 : f32
    %5 = vector.broadcast %cst_1 : f32 to vector<32x1xf32>
    %6 = arith.maximumf %4, %5 : vector<32x1xf32>
    %7 = vector.broadcast %6 : vector<32x1xf32> to vector<32x8xf32>
    %8 = arith.divf %0, %7 : vector<32x8xf32>
    %cst_2 = arith.constant dense<0xFF800000> : vector<8xf32>
    %9 = vector.multi_reduction <maximumf>, %8, %cst_2 [0] : vector<32x8xf32> to vector<8xf32>
    %10 = vector.shape_cast %9 : vector<8xf32> to vector<1x8xf32>
    %11 = vector.broadcast %10 : vector<1x8xf32> to vector<32x8xf32>
    %12 = arith.subf %8, %11 : vector<32x8xf32>
    %13 = math.exp %12 : vector<32x8xf32>
    %cst_3 = arith.constant dense<0.000000e+00> : vector<8xf32>
    %14 = vector.multi_reduction <add>, %13, %cst_3 [0] : vector<32x8xf32> to vector<8xf32>
    %15 = vector.shape_cast %14 : vector<8xf32> to vector<1x8xf32>
    %16 = vector.broadcast %15 : vector<1x8xf32> to vector<32x8xf32>
    %17 = arith.divf %13, %16 : vector<32x8xf32>
    %c0_4 = arith.constant 0 : index
    %c0_5 = arith.constant 0 : index
    %18 = vector.load %arg1[%c0_4, %c0_5] : memref<32x64xf32, #tpu.memory_space<vmem>>, vector<32x64xf32>
    %cst_6 = arith.constant dense<0.000000e+00> : vector<64x8xf32>
    %19 = tpu.matmul %18, %17, %cst_6 {dimension_numbers = #tpu.dot_dimension_numbers<[0], [0], [1], [1], [0, 1, 1, 1], [], []>} : vector<32x64xf32>, vector<32x8xf32>, vector<64x8xf32> -> vector<64x8xf32>
    %c0_7 = arith.constant 0 : index
    %c0_8 = arith.constant 0 : index
    %20 = vector.load %arg2[%c0_7, %c0_8] : memref<8x8xf32, #tpu.memory_space<vmem>>, vector<8x8xf32>
    %cst_9 = arith.constant dense<0xFF800000> : vector<8xf32>
    %21 = vector.multi_reduction <maximumf>, %20, %cst_9 [1] : vector<8x8xf32> to vector<8xf32>
    %22 = vector.shape_cast %21 : vector<8xf32> to vector<8x1xf32>
    %23 = vector.broadcast %22 : vector<8x1xf32> to vector<8x8xf32>
    %24 = arith.subf %20, %23 : vector<8x8xf32>
    %25 = math.exp %24 : vector<8x8xf32>
    %cst_10 = arith.constant dense<0.000000e+00> : vector<8xf32>
    %26 = vector.multi_reduction <add>, %25, %cst_10 [1] : vector<8x8xf32> to vector<8xf32>
    %27 = vector.shape_cast %26 : vector<8xf32> to vector<8x1xf32>
    %28 = vector.broadcast %27 : vector<8x1xf32> to vector<8x8xf32>
    %29 = arith.divf %25, %28 : vector<8x8xf32>
    %cst_11 = arith.constant dense<0.000000e+00> : vector<8x64xf32>
    %30 = tpu.matmul %29, %19, %cst_11 {dimension_numbers = #tpu.dot_dimension_numbers<[1], [1], [0], [0], [0, 0, 1, 0], [], []>} : vector<8x8xf32>, vector<64x8xf32>, vector<8x64xf32> -> vector<8x64xf32>
    %cst_12 = arith.constant 9.99999993E-9 : f32
    %31 = vector.broadcast %cst_12 : f32 to vector<8x64xf32>
    %32 = arith.addf %30, %31 : vector<8x64xf32>
    %33 = math.log %32 : vector<8x64xf32>
    %cst_13 = arith.constant 0.000000e+00 : f32
    %34 = vector.broadcast %cst_13 : f32 to vector<8x64xf32>
    %35 = arith.subf %34, %33 : vector<8x64xf32>
    %c0_14 = arith.constant 0 : index
    %c0_15 = arith.constant 0 : index
    %36 = vector.load %arg3[%c0_14, %c0_15] : memref<8x64xf32, #tpu.memory_space<vmem>>, vector<8x64xf32>
    %37 = arith.mulf %35, %36 : vector<8x64xf32>
    %cst_16 = arith.constant dense<0.000000e+00> : vector<8xf32>
    %38 = vector.multi_reduction <add>, %37, %cst_16 [1] : vector<8x64xf32> to vector<8xf32>
    %39 = vector.shape_cast %38 : vector<8xf32> to vector<8x1xf32>
    %cst_17 = arith.constant dense<0.000000e+00> : vector<1xf32>
    %40 = vector.multi_reduction <add>, %39, %cst_17 [0] : vector<8x1xf32> to vector<1xf32>
    %41 = vector.shape_cast %40 : vector<1xf32> to vector<1x1xf32>
    %cst_18 = arith.constant 8.000000e+00 : f32
    %42 = vector.broadcast %cst_18 : f32 to vector<1x1xf32>
    %43 = arith.divf %41, %42 : vector<1x1xf32>
    %c0_19 = arith.constant 0 : index
    %c0_20 = arith.constant 0 : index
    %44 = vector.load %arg4[%c0_19, %c0_20] : memref<1x1xf32, #tpu.memory_space<vmem>>, vector<1x1xf32>
    tpu.vector_store %arg4[%c0_19, %c0_20], %43 {strides = array<i32>} : memref<1x1xf32, #tpu.memory_space<vmem>>, vector<1x1xf32>,
    return
  }
}

</mosaic_0001>

<bundles_post_ra>
// kernel: forward.13
= control target key start
LH: loop header
LB: loop body
LE: loop exit
PB: predicated region body
PF: predicated region fallthrough
CT: control target
= control target key end

     0   :  { %vm31_vm0 = vcmask 64512   ;;  %v405_v16 = vmov 0.0   ;;  %vm406_vm1 = vmmov 0   ;;  %v407_v18 = vmov 1.0   ;;  %s484_s2 = inlined_call_operand.vmem [shape: f32[8,8], index: 2, kind: input, shape index: {}]   ;;  %s485_s0 = inlined_call_operand.vmem [shape: f32[32,8], index: 0, kind: input, shape index: {}]   ;;  %s486_s1 = inlined_call_operand.vmem [shape: f32[8,8], index: 1, kind: input, shape index: {}]   ;;  %s487_s3 = inlined_call_operand.vmem [shape: f32[1,8], index: 3, kind: input, shape index: {}]   ;;  %s488_s4 = inlined_call_operand.vmem [shape: f32[32,8], index: 4, kind: output, shape index: {}]  }
   0x1   :  { %v22_v0 = vld [vmem:[%s484_s2] sm:$0xff]  ;;  %v18_v7 = vld [vmem:[%s485_s0 + $0x8] sm:$0xff]  ;;  %v19_v8 = vld [vmem:[%s485_s0 + $0x10] sm:$0xff]  ;;  %v320_v19 = vlaneseq }
   0x2   :  { %v17_v1 = vld [vmem:[%s485_s0] sm:$0xff]  ;;  %v24_v2 = vsub.f32 0.0, %v22_v0  ;;  %v28_v12 = vmul.f32 %v18_v7, %v18_v7  ;;  %v29_v13 = vmul.f32 %v19_v8, %v19_v8  ;;  %v20_v14 = vld [vmem:[%s485_s0 + $0x18] sm:$0xff] }
   0x3   :  { %v27_v3 = vmul.f32 %v17_v1, %v17_v1  ;;  %389 = vmatprep.mubr.msk.f32.mxu1 %vm31_vm0, %v17_v1  ;;  %v21_v5 = vld [vmem:[%s486_s1] sm:$0xff]  ;;  %v30_v17 = vmul.f32 %v20_v14, %v20_v14  ;;  %v321_v22 = vshrl.u32 %v320_v19, 7 }
   0x4   :  { %v25_v4 = vmul.f32 1.442695, %v24_v2  ;;  %v233_v6 = vmul.f32 %v21_v5, %v21_v5  ;;  %v366_v48 = vld [vmem:[%s487_s3] ss:$0 sm:$0xff] }
   0x5   :  { %381 = vmatprep.mubr.msk.f32.mxu0 %vm31_vm0, %v27_v3  ;;  %v322_v30 = vsub.s32 0, %v321_v22 }
   0x6   :  { %403 = vpow2.f32 %v25_v4 }
  0x10   :  { %v404_v9 = vpop.eup %403 }
  0x11   :  { %379 = vmatprep.subr.msk.mxu0 %vm31_vm0, %v404_v9  ;;  %v132_v10 = vmul.f32 %v404_v9, %v21_v5  ;;  %v234_v11 = vmul.f32 %v404_v9, %v233_v6 }
  0x12   :  { %380 = vmatpush3.xpose.msk.msra.mxu0 %vm31_vm0, %v404_v9 }
  0x13   :  { %387 = vmatprep.subr.msk.mxu1 %vm31_vm0, %v132_v10  ;;  %v235_v15 = vadd.f32 %v234_v11, %v22_v0  ;;  %395 = vmatprep.subr.mxu0 %v405_v16 }
  0x14   :  { %388 = vmatpush3.xpose.msk.msra.mxu1 %vm31_vm0, %v132_v10 }
  0x15   :  { %382 = vmatmul.mubr.msk.f32.vlgmr.msra.gmra.mrb[0].mxu0 %vm31_vm0, %v28_v12 }
  0x16   :  { %396 = vmatpush3.xpose.msk.msra.mxu0 %vm31_vm0, %v235_v15  ;;  %384 = vmatprep.mubr.msk.f32.mxu0 %vm31_vm0, %v29_v13 }
  0x17   :  { %390 = vmatmul.mubr.msk.f32.vlgmr.msra.gmra.mrb[0].mxu1 %vm31_vm0, %v18_v7 }
  0x18   :  { %392 = vmatprep.mubr.msk.f32.mxu1 %vm31_vm0, %v19_v8 }
  0x19   :  { %385 = vmatmul.mubr.msk.f32.gmra.mrb[2].mxu0 %vm31_vm0, %v30_v17 }
  0x1a   :  { %397 = vmatprep.mubr.msk.f32.mxu0 %vm406_vm1, %v405_v16 }
  0x1b   :  { %393 = vmatmul.mubr.msk.f32.gmra.mrb[2].mxu1 %vm31_vm0, %v20_v14 }
  0x1d   :  { %398 = vmatmul.mubr.msk.f32.vlgmr.msra.gmra.mrb[4].mxu0 %vm31_vm0, %v407_v18 }
  0xe8   :  { %v383_v20 = vpop.f32.mrb[0].mxu0 }
  0xe9   :  { %v113_v21 = vpop.f32.mrb[1].mxu0 }
  0xea   :  { %v391_v23 = vpop.f32.mrb[0].mxu1 }
  0xeb   :  { %v313_v24 = vmul.f32 2.0, %v391_v23  ;;  %v214_v25 = vpop.f32.mrb[1].mxu1 }
  0xec   :  { %v312_v26 = vmul.f32 2.0, %v214_v25  ;;  %v386_v27 = vpop.f32.mrb[2].mxu0 }
  0xed   :  { %v317_v28 = vsub.f32 %v383_v20, %v313_v24  ;;  %v123_v29 = vpop.f32.mrb[3].mxu0 }
  0xee   :  { %v316_v31 = vsub.f32 %v113_v21, %v312_v26  ;;  %v394_v32 = vpop.f32.mrb[2].mxu1 }
  0xef   :  { %v315_v33 = vmul.f32 2.0, %v394_v32  ;;  %v224_v34 = vpop.f32.mrb[3].mxu1 }
  0xf0   :  { %v314_v35 = vmul.f32 2.0, %v224_v34  ;;  %v308_v36 = vpop.f32.mrb[4].mxu0 }
  0xf1   :  { %v319_v37 = vsub.f32 %v386_v27, %v315_v33  ;;  %v323_v38 = vrot.slane %v308_v36, %v322_v30  ;;  %v399_v39 = vpop.f32.mrb[5].mxu0 }
  0xf2   :  { %v318_v40 = vsub.f32 %v123_v29, %v314_v35 }
  0xf3   :  { %v324_v41 = vadd.f32 %v323_v38, %v316_v31  ;;  %v325_v42 = vadd.f32 %v323_v38, %v317_v28  ;;  %v327_v43 = vadd.f32 %v323_v38, %v319_v37 }
  0xf4   :  { %v326_v44 = vadd.f32 %v323_v38, %v318_v40 }
  0xf5   :  { %v328_v45 = vmul.f32 -0.5, %v324_v41  ;;  %v329_v46 = vmul.f32 -0.5, %v325_v42  ;;  %v331_v47 = vmul.f32 -0.5, %v327_v43 }
  0xf6   :  { %v330_v49 = vmul.f32 -0.5, %v326_v44 }
  0xf7   :  { %v332_v50 = vadd.f32 -7.351508, %v328_v45  ;;  %v333_v51 = vadd.f32 -7.351508, %v329_v46  ;;  %v335_v52 = vadd.f32 -7.351508, %v331_v47 }
  0xf8   :  { %v334_v53 = vadd.f32 -7.351508, %v330_v49 }
  0xf9   :  { %v342_v54 = vadd.f32 %v366_v48, %v332_v50  ;;  %v343_v55 = vadd.f32 %v366_v48, %v333_v51  ;;  %v345_v56 = vadd.f32 %v366_v48, %v335_v52 }
  0xfa   :  { %v344_v57 = vadd.f32 %v366_v48, %v334_v53 }
  0xfb   :  { %346 = vst.msk [vmem:[%s488_s4] sm:$0xff] %vm31_vm0, %v342_v54  ;;  %347 = vst.msk [vmem:[%s488_s4 + $0x8] sm:$0xff] %vm31_vm0, %v343_v55 }
  0xfc   :  { %349 = vst.msk [vmem:[%s488_s4 + $0x18] sm:$0xff] %vm31_vm0, %v345_v56  ;;  %348 = vst.msk [vmem:[%s488_s4 + $0x10] sm:$0xff] %vm31_vm0, %v344_v57 }

// kernel: forward.17
= control target key start
LH: loop header
LB: loop body
LE: loop exit
PB: predicated region body
PF: predicated region fallthrough
CT: control target
= control target key end

     0   :  { %vm20_vm0 = vcmask 64512   ;;  %vm210_vm1 = vcmask 261120   ;;  %s573_s0 = inlined_call_operand.vmem [shape: f32[32,8], index: 0, kind: input, shape index: {}]   ;;  %s574_s1 = inlined_call_operand.vmem [shape: f32[32,32], index: 1, kind: input, shape index: {}]   ;;  %s575_s2 = inlined_call_operand.hbm [shape: f32[1,1], index: 2, kind: output, shape index: {}]  }
   0x1   :  { %v12_v0 = vld [vmem:[%s573_s0] sm:$0xff]  ;;  %v13_v1 = vld [vmem:[%s573_s0 + $0x8] sm:$0xff]  ;;  %v14_v2 = vld [vmem:[%s573_s0 + $0x10] sm:$0xff] }
   0x2   :  { %v336_v3 = vpack.c.bf16 %v13_v1, %v12_v0  ;;  %vm438_vm2 = vmpackc.low %vm20_vm0, %vm20_vm0  ;;  %v15_v5 = vld [vmem:[%s573_s0 + $0x18] sm:$0xff]  ;;  %330 = vmatprep.mubr.msk.f32.mxu0 %vm20_vm0, %v12_v0  ;;  %333 = vmatprep.mubr.msk.f32.mxu1 %vm20_vm0, %v14_v2  ;;  %v450_v6 = vld [vmem:[%s574_s1] sm:$0xff] }
   0x3   :  { %v342_v7 = vpack.c.bf16 %v15_v5, %v14_v2  ;;  %v455_v8 = vld [vmem:[%s574_s1 + $0x10] sm:$0xff]  ;;  %v211_v9 = vsel %vm210_vm1, %v450_v6, 0.0 }
   0x4   :  { %338 = vmatprep.subr.msk.bf16.mxu0 %vm438_vm2, %v336_v3  ;;  %348 = vmatprep.subr.msk.bf16.mxu1 %vm438_vm2, %v336_v3  ;;  %v217_v10 = vsel %vm210_vm1, %v455_v8, 0.0 }
   0x5   :  { %7 = vsyncpa [#allocation3], 0  ;;  %341 = vmatpush3.bf16.xpose.msk.msra.mxu0 %vm438_vm2, %v336_v3  ;;  %350 = vmatpush3.bf16.xpose.msk.msra.mxu1 %vm438_vm2, %v336_v3  ;;  %v472_v11 = vld [vmem:[%s574_s1 + $0x8] sm:$0xff]  ;;  %v477_v12 = vld [vmem:[%s574_s1 + $0x18] sm:$0xff]  ;;  %vm235_vm4 = vcmp.eq.f32.partialorder %v450_v6, 1.0  ;;  %vm237_vm6 = vcmp.eq.f32.partialorder %v455_v8, 1.0 }
   0x6   :  { %344 = vmatprep.subr.msk.bf16.mxu0 %vm438_vm2, %v342_v7  ;;  %349 = vmatprep.subr.msk.bf16.mxu1 %vm438_vm2, %v342_v7  ;;  %v214_v13 = vsel %vm210_vm1, %v472_v11, 0.0  ;;  %v220_v14 = vsel %vm210_vm1, %v477_v12, 0.0  ;;  %vm236_vm3 = vcmp.eq.f32.partialorder %v472_v11, 1.0  ;;  %vm238_vm5 = vcmp.eq.f32.partialorder %v477_v12, 1.0  ;;  %s411_s1 = smov [#allocation2]  }
   0x7   :  { %212 = vadd.xlane.f32.xlu0 %v211_v9  ;;  %218 = vadd.xlane.f32.xlu1 %v217_v10  ;;  %s298_s24 = sshll.u32 %s411_s1, 4  ;;  %vm290_vm7 = vcmask 0   ;;  %s299_s24 = int_to_ptr.vmem [resolvable:$true] %s298_s24 }
   0x8   :  { %s387_s25 = scalar_lea.vmem %s299_s24, 16  ;;  %s391_s26 = scalar_lea.vmem %s299_s24, 32 }
   0x9   :  { %p388_p0 = scmp.ne.s32.totalorder %s299_s24, %s387_s25  ;;  %p392_p1 = scmp.lt.s32.totalorder %s299_s24, %s299_s24 }
   0xa   :  { %p393_p2 = scmp.lt.s32.totalorder %s391_s26, %s387_s25 }
   0xb   :  { %215 = vadd.xlane.f32.xlu0 %v214_v13  ;;  %221 = vadd.xlane.f32.xlu1 %v220_v14 }
   0xc   :  { %p394_p3 = por %p393_p2, %p392_p1 }
   0xd   :  { %347 = vmatpush3.bf16.xpose.msk.msra.mxu0 %vm438_vm2, %v342_v7  ;;  %351 = vmatpush3.bf16.xpose.msk.msra.mxu1 %vm438_vm2, %v342_v7 }
   0xe   :  { %p395_p4 = pnand %p394_p3, %p388_p0 }
  0x14   :  { %331 = vmatmul.mubr.msk.f32.vlgmr.msra.gmra.mrb[0].mxu0 %vm20_vm0, %v13_v1  ;;  %334 = vmatmul.mubr.msk.f32.vlgmr.msra.gmra.mrb[0].mxu1 %vm20_vm0, %v15_v5 }
  0x94   :  { %v213_v15 = vpop.xlane.xlu0 %212  ;;  %v219_v17 = vpop.xlane.xlu1 %218 }
  0x98   :  { %v216_v16 = vpop.xlane.xlu0 %215  ;;  %v222_v20 = vpop.xlane.xlu1 %221 }
  0x99   :  { %v223_v18 = vadd.f32 %v216_v16, %v213_v15 }
  0x9b   :  { %v224_v19 = vadd.f32 %v223_v18, %v219_v17 }
  0x9d   :  { %v225_v21 = vadd.f32 %v224_v19, %v222_v20  ;;  %v251_v20 = vsub.f32 1.0, %v450_v6 }
  0x9f   :  { %v226_v22 = vrot.slane %v225_v21, 4 }
  0xa1   :  { %v227_v23 = vadd.f32 %v226_v22, %v225_v21  ;;  %v253_v21 = vsub.f32 1.0, %v455_v8 }
  0xa3   :  { %v228_v24 = vrot.slane %v227_v23, 2 }
  0xa5   :  { %v229_v34 = vadd.f32 %v228_v24, %v227_v23 }
  0xa7   :  { %v230_v47 = vrot.slane %v229_v34, 1 }
  0xa9   :  { %v231_v57 = vadd.f32 %v230_v47, %v229_v34 }
  0xab   :  { %v232_v14 = vsub.f32 1024.0, %v231_v57 }
  0xe7   :  { %v493_v25 = vpop.f32.mrb[0].mxu0  ;;  %v495_v26 = vpop.f32.mrb[0].mxu1 }
  0xe8   :  { %v119_v27 = vsub.f32 0.0, %v493_v25  ;;  %v171_v28 = vand.u32 2147483647, %v493_v25  ;;  %v121_v29 = vsub.f32 0.0, %v495_v26  ;;  %v500_v30 = vpop.f32.mrb[1].mxu0  ;;  %v504_v33 = vpop.f32.mrb[1].mxu1 }
  0xe9   :  { %v173_v31 = vand.u32 2147483647, %v495_v26  ;;  %v118_v32 = vsub.f32 0.0, %v500_v30  ;;  %v170_v42 = vand.u32 2147483647, %v500_v30  ;;  %v120_v43 = vsub.f32 0.0, %v504_v33 }
  0xea   :  { %v127_v35 = vand.u32 2147483647, %v119_v27  ;;  %v175_v36 = vsub.f32 0.0, %v171_v28  ;;  %v129_v37 = vand.u32 2147483647, %v121_v29  ;;  %v167_v23 = vmax.f32 %v493_v25, 0.0 }
  0xeb   :  { %v177_v38 = vsub.f32 0.0, %v173_v31  ;;  %v126_v39 = vand.u32 2147483647, %v118_v32  ;;  %v174_v49 = vsub.f32 0.0, %v170_v42  ;;  %v128_v52 = vand.u32 2147483647, %v120_v43 }
  0xec   :  { %v131_v40 = vsub.f32 0.0, %v127_v35  ;;  %v180_v41 = vmul.f32 1.442695, %v175_v36  ;;  %v133_v44 = vsub.f32 0.0, %v129_v37  ;;  %v172_v54 = vand.u32 2147483647, %v504_v33 }
  0xed   :  { %v184_v45 = vmul.f32 1.442695, %v177_v38  ;;  %v130_v46 = vsub.f32 0.0, %v126_v39  ;;  %v178_v53 = vmul.f32 1.442695, %v174_v49  ;;  %v132_v55 = vsub.f32 0.0, %v128_v52 }
  0xee   :  { %v136_v48 = vmul.f32 1.442695, %v131_v40  ;;  %353 = vpow2.f32 %v180_v41  ;;  %v140_v50 = vmul.f32 1.442695, %v133_v44  ;;  %v176_v56 = vsub.f32 0.0, %v172_v54 }
  0xef   :  { %355 = vpow2.f32 %v184_v45  ;;  %v134_v51 = vmul.f32 1.442695, %v130_v46  ;;  %v138_v58 = vmul.f32 1.442695, %v132_v55  ;;  %v169_v31 = vmax.f32 %v495_v26, 0.0 }
  0xf0   :  { %357 = vpow2.f32 %v136_v48  ;;  %v182_v59 = vmul.f32 1.442695, %v176_v56  ;;  %v252_v35 = vsub.f32 1.0, %v472_v11  ;;  %v254_v36 = vsub.f32 1.0, %v477_v12 }
  0xf1   :  { %359 = vpow2.f32 %v140_v50  ;;  %v123_v38 = vmax.f32 %v119_v27, 0.0  ;;  %v125_v44 = vmax.f32 %v121_v29, 0.0  ;;  %v122_v25 = vmax.f32 %v118_v32, 0.0 }
  0xf2   :  { %361 = vpow2.f32 %v134_v51  ;;  %v166_v26 = vmax.f32 %v500_v30, 0.0 }
  0xf3   :  { %363 = vpow2.f32 %v178_v53 }
  0xf4   :  { %365 = vpow2.f32 %v138_v58 }
  0xf5   :  { %367 = vpow2.f32 %v182_v59 }
  0xf6   :  { %369 = vrcp.f32 %v231_v57  ;;  %v124_v57 = vmax.f32 %v120_v43, 0.0 }
  0xf8   :  { %v354_v60 = vpop.eup %353 }
  0xf9   :  { %v356_v61 = vpop.eup %355  ;;  %v187_v62 = vadd.f32 1.0, %v354_v60 }
  0xfa   :  { %v358_v63 = vpop.eup %357  ;;  %v189_v0 = vadd.f32 1.0, %v356_v61 }
  0xfb   :  { %v360_v1 = vpop.eup %359  ;;  %v143_v2 = vadd.f32 1.0, %v358_v63  ;;  %371 = vlog2.f32 %v187_v62  ;;  %v168_v63 = vmax.f32 %v504_v33, 0.0 }
  0xfc   :  { %v362_v3 = vpop.eup %361  ;;  %v145_v4 = vadd.f32 1.0, %v360_v1  ;;  %373 = vlog2.f32 %v189_v0 }
  0xfd   :  { %v364_v5 = vpop.eup %363  ;;  %375 = vlog2.f32 %v143_v2  ;;  %v142_v7 = vadd.f32 1.0, %v362_v3 }
  0xfe   :  { %377 = vlog2.f32 %v145_v4  ;;  %v186_v9 = vadd.f32 1.0, %v364_v5  ;;  %v366_v10 = vpop.eup %365 }
  0xff   :  { %379 = vlog2.f32 %v142_v7  ;;  %v368_v13 = vpop.eup %367  ;;  %v144_v15 = vadd.f32 1.0, %v366_v10 }
 0x100   :  { %381 = vlog2.f32 %v186_v9  ;;  %v370_v16 = vpop.eup %369  ;;  %v188_v17 = vadd.f32 1.0, %v368_v13 }
 0x101   :  { %383 = vlog2.f32 %v144_v15  ;;  %v517_v18 = vmul.f32 %v370_v16, %v232_v14 }
 0x102   :  { %385 = vlog2.f32 %v188_v17 }
 0x103   :  { %v240_v41 = vsel %vm236_vm3, %v517_v18, 1.0  ;;  %v239_v47 = vsel %vm235_vm4, %v517_v18, 1.0  ;;  %v242_v4 = vsel %vm238_vm5, %v517_v18, 1.0 }
 0x104   :  { %v244_v16 = vsub.f32 0.0, %v240_v41 }
 0x105   :  { %v372_v19 = vpop.eup %371 }
 0x106   :  { %v374_v22 = vpop.eup %373  ;;  %v193_v24 = vmul.f32 0.6931472, %v372_v19 }
 0x107   :  { %v376_v28 = vpop.eup %375  ;;  %v197_v34 = vmul.f32 0.6931472, %v374_v22 }
 0x108   :  { %v378_v37 = vpop.eup %377  ;;  %v149_v39 = vmul.f32 0.6931472, %v376_v28  ;;  %v199_v40 = vadd.f32 %v193_v24, %v167_v23 }
 0x109   :  { %v380_v42 = vpop.eup %379  ;;  %v153_v45 = vmul.f32 0.6931472, %v378_v37  ;;  %v201_v46 = vadd.f32 %v197_v34, %v169_v31  ;;  %v246_v34 = vsub.f32 0.0, %v242_v4 }
 0x10a   :  { %v382_v48 = vpop.eup %381  ;;  %v155_v49 = vadd.f32 %v149_v39, %v123_v38  ;;  %v203_v50 = vsub.f32 0.0, %v199_v40  ;;  %v147_v27 = vmul.f32 0.6931472, %v380_v42 }
 0x10b   :  { %v157_v51 = vadd.f32 %v153_v45, %v125_v44  ;;  %v205_v52 = vsub.f32 0.0, %v201_v46  ;;  %v191_v29 = vmul.f32 0.6931472, %v382_v48  ;;  %v384_v53 = vpop.eup %383 }
 0x10c   :  { %v159_v54 = vsub.f32 0.0, %v155_v49  ;;  %v207_v55 = vmax.f32 %v203_v50, -100.0  ;;  %v154_v56 = vadd.f32 %v147_v27, %v122_v25  ;;  %v386_v58 = vpop.eup %385  ;;  %v151_v32 = vmul.f32 0.6931472, %v384_v53 }
 0x10d   :  { %v161_v59 = vsub.f32 0.0, %v157_v51  ;;  %v209_v60 = vmax.f32 %v205_v52, -100.0  ;;  %v198_v61 = vadd.f32 %v191_v29, %v166_v26  ;;  %v195_v0 = vmul.f32 0.6931472, %v386_v58 }
 0x10e   :  { %v158_v62 = vsub.f32 0.0, %v154_v56  ;;  %v163_v1 = vmax.f32 %v159_v54, -100.0  ;;  %v156_v30 = vadd.f32 %v151_v32, %v124_v57  ;;  %v256_v9 = vmul.f32 %v252_v35, %v207_v55 }
 0x10f   :  { %v202_v2 = vsub.f32 0.0, %v198_v61  ;;  %v165_v3 = vmax.f32 %v161_v59, -100.0  ;;  %v200_v7 = vadd.f32 %v195_v0, %v168_v63  ;;  %v258_v15 = vmul.f32 %v254_v36, %v209_v60 }
 0x110   :  { %v162_v5 = vmax.f32 %v158_v62, -100.0  ;;  %v248_v43 = vmul.f32 %v163_v1, %v472_v11  ;;  %v160_v13 = vsub.f32 0.0, %v156_v30  ;;  %v243_v11 = vsub.f32 0.0, %v239_v47 }
 0x111   :  { %v206_v10 = vmax.f32 %v202_v2, -100.0  ;;  %v250_v14 = vmul.f32 %v165_v3, %v477_v12  ;;  %v204_v33 = vsub.f32 0.0, %v200_v7  ;;  %v241_v12 = vsel %vm237_vm6, %v517_v18, 1.0 }
 0x112   :  { %v260_v17 = vadd.f32 %v256_v9, %v248_v43  ;;  %v247_v19 = vmul.f32 %v162_v5, %v450_v6  ;;  %v164_v22 = vmax.f32 %v160_v13, -100.0 }
 0x113   :  { %v255_v23 = vmul.f32 %v251_v20, %v206_v10  ;;  %v262_v24 = vadd.f32 %v258_v15, %v250_v14  ;;  %v208_v28 = vmax.f32 %v204_v33, -100.0  ;;  %v245_v20 = vsub.f32 0.0, %v241_v12 }
 0x114   :  { %v264_v31 = vmul.f32 %v260_v17, %v244_v16  ;;  %v249_v36 = vmul.f32 %v164_v22, %v455_v8 }
 0x115   :  { %v259_v35 = vadd.f32 %v255_v23, %v247_v19  ;;  %v266_v38 = vmul.f32 %v262_v24, %v246_v34  ;;  %v257_v39 = vmul.f32 %v253_v21, %v208_v28 }
 0x116   :  { %v270_v37 = vsel %vm210_vm1, %v264_v31, 0.0 }
 0x117   :  { %271 = vadd.xlane.f32.xlu1 %v270_v37  ;;  %v263_v6 = vmul.f32 %v259_v35, %v243_v11  ;;  %v261_v40 = vadd.f32 %v257_v39, %v249_v36  ;;  %v276_v42 = vsel %vm210_vm1, %v266_v38, 0.0 }
 0x119   :  { %v267_v41 = vsel %vm210_vm1, %v263_v6, 0.0  ;;  %v265_v44 = vmul.f32 %v261_v40, %v245_v20 }
 0x11a   :  { %268 = vadd.xlane.f32.xlu0 %v267_v41 }
 0x11b   :  { %277 = vadd.xlane.f32.xlu1 %v276_v42  ;;  %v273_v18 = vsel %vm210_vm1, %v265_v44, 0.0 }
 0x11e   :  { %274 = vadd.xlane.f32.xlu0 %v273_v18 }
 0x1a4   :  { %v272_v45 = vpop.xlane.xlu1 %271 }
 0x1a7   :  { %v269_v46 = vpop.xlane.xlu0 %268 }
 0x1a8   :  { %v279_v47 = vadd.f32 %v272_v45, %v269_v46  ;;  %v278_v21 = vpop.xlane.xlu1 %277 }
 0x1ab   :  { %v275_v48 = vpop.xlane.xlu0 %274 }
 0x1ac   :  { %v280_v8 = vadd.f32 %v279_v47, %v275_v48 }
 0x1ae   :  { %v281_v49 = vadd.f32 %v280_v8, %v278_v21 }
 0x1b0   :  { %v282_v50 = vrot.slane %v281_v49, 4 }
 0x1b2   :  { %v283_v25 = vadd.f32 %v282_v50, %v281_v49 }
 0x1b4   :  { %v284_v27 = vrot.slane %v283_v25, 2 }
 0x1b6   :  { %v285_v51 = vadd.f32 %v284_v27, %v283_v25 }
 0x1b8   :  { %v286_v52 = vrot.slane %v285_v51, 1 }
 0x1ba   :  { %v287_v26 = vadd.f32 %v286_v52, %v285_v51 }
 0x1bc   :  { %v289_v29 = vmul.f32 0.0009765625, %v287_v26 }
 0x1be   :  { %291 = vst.msk [vmem:[#allocation2] sm:$0x1] %vm290_vm7, %v289_v29 }
 0x1bf   :  { %398 = shalt.err (!%p395_p4)
}
 0x1c0   :  { %s399_s29 = scalar_lea.hbm %s575_s2, 16 }
 0x1c1   :  { %p400_p5 = scmp.ne.s32.totalorder %s575_s2, %s399_s29  ;;  %p403_p6 = scmp.lt.u32.totalorder %s399_s29, %s575_s2 }
 0x1c3   :  { %p405_p7 = pnand %p403_p6, %p400_p5 }
 0x1c5   :  { %408 = shalt.err (!%p405_p7)
}
 0x1c6   :  { %301 = dma.vmem_to_hbm [thread:$0]  %s299_s24, 16, %s575_s2, [#allocation3]  }
 0x1c7   :  { %409 = dma.done.wait [#allocation3], 16  }
 0x1c8   :  { %410 = vsyncadd [#allocation3], 4294967280 }
 0x1c9   :  { %305 = vsyncpa [#allocation3], 1 }

// kernel: forward.10
= control target key start
LH: loop header
LB: loop body
LE: loop exit
PB: predicated region body
PF: predicated region fallthrough
CT: control target
= control target key end

     0   :  { %vm34_vm0 = vcmask 64512   ;;  %v832_v18 = vmov 0.0   ;;  %vm833_vm1 = vmmov 0   ;;  %v834_v20 = vmov 1.0   ;;  %s987_s2 = inlined_call_operand.vmem [shape: f32[8,8], index: 2, kind: input, shape index: {}]   ;;  %s988_s0 = inlined_call_operand.vmem [shape: f32[32,8], index: 0, kind: input, shape index: {}]   ;;  %s989_s1 = inlined_call_operand.vmem [shape: f32[8,8], index: 1, kind: input, shape index: {}]   ;;  %s990_s3 = inlined_call_operand.vmem [shape: f32[1,8], index: 3, kind: input, shape index: {}]   ;;  %s991_s5 = inlined_call_operand.vmem [shape: f32[8,8], index: 5, kind: output, shape index: {1}]   ;;  %s992_s6 = inlined_call_operand.vmem [shape: f32[8,8], index: 6, kind: output, shape index: {2}]   ;;  %s993_s4 = inlined_call_operand.vmem [shape: f32[1,8], index: 4, kind: output, shape index: {0}]  }
   0x1   :  { %v25_v0 = vld [vmem:[%s987_s2] sm:$0xff]  ;;  %v884_v3 = vld [vmem:[%s988_s0 + $0x8] sm:$0xff]  ;;  %v908_v11 = vld [vmem:[%s988_s0 + $0x10] sm:$0xff]  ;;  %v323_v21 = vlaneseq  ;;  %vm425_vm2 = vcmask 261120   ;;  %vm517_vm3 = vcmask 57344  }
   0x2   :  { %v879_v1 = vld [vmem:[%s988_s0] sm:$0xff]  ;;  %v27_v2 = vsub.f32 0.0, %v25_v0  ;;  %v894_v5 = vmul.f32 %v884_v3, %v884_v3  ;;  %v914_v15 = vmul.f32 %v908_v11, %v908_v11  ;;  %v919_v16 = vld [vmem:[%s988_s0 + $0x18] sm:$0xff] }
   0x3   :  { %v888_v4 = vmul.f32 %v879_v1, %v879_v1  ;;  %740 = vmatprep.mubr.msk.f32.mxu1 %vm34_vm0, %v879_v1  ;;  %v789_v6 = vpack.c.bf16 %v884_v3, %v879_v1  ;;  %v24_v9 = vld [vmem:[%s989_s1] sm:$0xff]  ;;  %v928_v19 = vmul.f32 %v919_v16, %v919_v16  ;;  %v324_v24 = vshrl.u32 %v323_v21, 7 }
   0x4   :  { %v28_v7 = vmul.f32 1.442695, %v27_v2  ;;  %v236_v10 = vmul.f32 %v24_v9, %v24_v9  ;;  %v699_v50 = vld [vmem:[%s990_s3] ss:$0 sm:$0xff] }
   0x5   :  { %732 = vmatprep.mubr.msk.f32.mxu0 %vm34_vm0, %v888_v4  ;;  %v795_v8 = vpack.c.bf16 %v894_v5, %v888_v4  ;;  %v325_v32 = vsub.s32 0, %v324_v24 }
   0x6   :  { %808 = vpow2.f32 %v28_v7 }
  0x10   :  { %v809_v12 = vpop.eup %808 }
  0x11   :  { %730 = vmatprep.subr.msk.mxu0 %vm34_vm0, %v809_v12  ;;  %v135_v13 = vmul.f32 %v809_v12, %v24_v9  ;;  %v237_v14 = vmul.f32 %v809_v12, %v236_v10 }
  0x12   :  { %731 = vmatpush3.xpose.msk.msra.mxu0 %vm34_vm0, %v809_v12 }
  0x13   :  { %738 = vmatprep.subr.msk.mxu1 %vm34_vm0, %v135_v13  ;;  %v238_v17 = vadd.f32 %v237_v14, %v25_v0  ;;  %746 = vmatprep.subr.mxu0 %v832_v18 }
  0x14   :  { %739 = vmatpush3.xpose.msk.msra.mxu1 %vm34_vm0, %v135_v13 }
  0x15   :  { %733 = vmatmul.mubr.msk.f32.vlgmr.msra.gmra.mrb[0].mxu0 %vm34_vm0, %v894_v5 }
  0x16   :  { %747 = vmatpush3.xpose.msk.msra.mxu0 %vm34_vm0, %v238_v17  ;;  %735 = vmatprep.mubr.msk.f32.mxu0 %vm34_vm0, %v914_v15 }
  0x17   :  { %741 = vmatmul.mubr.msk.f32.vlgmr.msra.gmra.mrb[0].mxu1 %vm34_vm0, %v884_v3 }
  0x18   :  { %743 = vmatprep.mubr.msk.f32.mxu1 %vm34_vm0, %v908_v11 }
  0x19   :  { %736 = vmatmul.mubr.msk.f32.gmra.mrb[2].mxu0 %vm34_vm0, %v928_v19 }
  0x1a   :  { %748 = vmatprep.mubr.msk.f32.mxu0 %vm833_vm1, %v832_v18 }
  0x1b   :  { %744 = vmatmul.mubr.msk.f32.gmra.mrb[2].mxu1 %vm34_vm0, %v919_v16 }
  0x1c   :  { %759 = vmatprep.mubr.msk.f32.mxu1 %vm833_vm1, %v832_v18 }
  0x1d   :  { %749 = vmatmul.mubr.msk.f32.vlgmr.msra.gmra.mrb[4].mxu0 %vm34_vm0, %v834_v20 }
  0x1e   :  { %770 = vmatprep.mubr.msk.f32.mxu0 %vm833_vm1, %v832_v18 }
  0xe8   :  { %v734_v22 = vpop.f32.mrb[0].mxu0 }
  0xe9   :  { %v116_v23 = vpop.f32.mrb[1].mxu0 }
  0xea   :  { %v742_v25 = vpop.f32.mrb[0].mxu1 }
  0xeb   :  { %v316_v26 = vmul.f32 2.0, %v742_v25  ;;  %v217_v27 = vpop.f32.mrb[1].mxu1 }
  0xec   :  { %v315_v28 = vmul.f32 2.0, %v217_v27  ;;  %v737_v29 = vpop.f32.mrb[2].mxu0 }
  0xed   :  { %v320_v30 = vsub.f32 %v734_v22, %v316_v26  ;;  %v126_v31 = vpop.f32.mrb[3].mxu0 }
  0xee   :  { %v319_v33 = vsub.f32 %v116_v23, %v315_v28  ;;  %v745_v34 = vpop.f32.mrb[2].mxu1 }
  0xef   :  { %v318_v35 = vmul.f32 2.0, %v745_v34  ;;  %v227_v36 = vpop.f32.mrb[3].mxu1 }
  0xf0   :  { %v317_v37 = vmul.f32 2.0, %v227_v36  ;;  %v311_v38 = vpop.f32.mrb[4].mxu0 }
  0xf1   :  { %v322_v39 = vsub.f32 %v737_v29, %v318_v35  ;;  %v326_v40 = vrot.slane %v311_v38, %v325_v32  ;;  %v750_v41 = vpop.f32.mrb[5].mxu0  ;;  %v836_v32 = vmov 1.0|1.0  }
  0xf2   :  { %v321_v42 = vsub.f32 %v126_v31, %v317_v37  ;;  %v835_v31 = vmov 0.0|0.0  }
  0xf3   :  { %v327_v43 = vadd.f32 %v326_v40, %v319_v33  ;;  %v328_v44 = vadd.f32 %v326_v40, %v320_v30  ;;  %v330_v45 = vadd.f32 %v326_v40, %v322_v39  ;;  %784 = vmatprep.subr.bf16.mxu1 %v835_v31  ;;  %788 = vmatprep.subr.bf16.mxu0 %v835_v31 }
  0xf4   :  { %v329_v46 = vadd.f32 %v326_v40, %v321_v42  ;;  %785 = vmatpush3.bf16.msra.mxu1 %v836_v32  ;;  %790 = vmatpush3.bf16.msra.mxu0 %v789_v6  ;;  %v792_v33 = vpack.c.bf16 %v919_v16, %v908_v11 }
  0xf5   :  { %v331_v47 = vmul.f32 -0.5, %v327_v43  ;;  %v332_v48 = vmul.f32 -0.5, %v328_v44  ;;  %v334_v49 = vmul.f32 -0.5, %v330_v45  ;;  %786 = vmatprep.subr.bf16.mxu1 %v835_v31  ;;  %791 = vmatprep.subr.bf16.mxu0 %v835_v31 }
  0xf6   :  { %v333_v51 = vmul.f32 -0.5, %v329_v46 }
  0xf7   :  { %v335_v52 = vadd.f32 -7.351508, %v331_v47  ;;  %v336_v53 = vadd.f32 -7.351508, %v332_v48  ;;  %v338_v55 = vadd.f32 -7.351508, %v334_v49 }
  0xf8   :  { %v337_v54 = vadd.f32 -7.351508, %v333_v51  ;;  %787 = vmatpush3.bf16.msra.mxu1 %v836_v32  ;;  %793 = vmatpush3.bf16.msra.mxu0 %v792_v33  ;;  %v837_v48 = vmov 0  }
  0xf9   :  { %v345_v56 = vadd.f32 %v699_v50, %v335_v52  ;;  %v346_v59 = vadd.f32 %v699_v50, %v336_v53  ;;  %v348_v61 = vadd.f32 %v699_v50, %v338_v55  ;;  %794 = vmatprep.subr.bf16.mxu1 %v835_v31  ;;  %806 = vset.pattern.permute.xlu1 %v837_v48 }
  0xfa   :  { %v347_v57 = vadd.f32 %v699_v50, %v337_v54  ;;  %v798_v50 = vpack.c.bf16 %v928_v19, %v914_v15 }
  0xfb   :  { %v349_v58 = vsel %vm34_vm0, %v345_v56, -inf  ;;  %v352_v62 = vsel %vm34_vm0, %v346_v59, -inf  ;;  %v358_v63 = vsel %vm34_vm0, %v348_v61, -inf }
  0xfc   :  { %350 = vmax.xlane.f32.xlu0 %v349_v58  ;;  %v355_v60 = vsel %vm34_vm0, %v347_v57, -inf }
  0xfd   :  { %356 = vmax.xlane.f32.xlu1 %v355_v60 }
 0x100   :  { %353 = vmax.xlane.f32.xlu0 %v352_v62 }
 0x101   :  { %359 = vmax.xlane.f32.xlu1 %v358_v63 }
 0x189   :  { %v351_v0 = vpop.xlane.xlu0 %350 }
 0x18a   :  { %v361_v2 = vsub.f32 %v345_v56, %v351_v0  ;;  %v357_v7 = vpop.xlane.xlu1 %356 }
 0x18b   :  { %v363_v9 = vsub.f32 %v347_v57, %v357_v7 }
 0x18c   :  { %v365_v10 = vmul.f32 1.442695, %v361_v2 }
 0x18d   :  { %v369_v12 = vmul.f32 1.442695, %v363_v9  ;;  %v354_v13 = vpop.xlane.xlu0 %353 }
 0x18e   :  { %810 = vpow2.f32 %v365_v10  ;;  %v362_v14 = vsub.f32 %v346_v59, %v354_v13  ;;  %v360_v17 = vpop.xlane.xlu1 %359 }
 0x18f   :  { %v364_v20 = vsub.f32 %v348_v61, %v360_v17  ;;  %812 = vpow2.f32 %v369_v12 }
 0x190   :  { %v367_v21 = vmul.f32 1.442695, %v362_v14 }
 0x191   :  { %v371_v22 = vmul.f32 1.442695, %v364_v20 }
 0x192   :  { %814 = vpow2.f32 %v367_v21 }
 0x193   :  { %816 = vpow2.f32 %v371_v22 }
 0x198   :  { %v811_v23 = vpop.eup %810 }
 0x199   :  { %v373_v24 = vsel %vm34_vm0, %v811_v23, 0.0  ;;  %v813_v25 = vpop.eup %812 }
 0x19a   :  { %374 = vadd.xlane.f32.xlu0 %v373_v24  ;;  %v379_v27 = vsel %vm34_vm0, %v813_v25, 0.0 }
 0x19c   :  { %v815_v26 = vpop.eup %814 }
 0x19d   :  { %v376_v28 = vsel %vm34_vm0, %v815_v26, 0.0  ;;  %v817_v29 = vpop.eup %816 }
 0x19e   :  { %380 = vadd.xlane.f32.xlu0 %v379_v27  ;;  %377 = vadd.xlane.f32.xlu1 %v376_v28  ;;  %v382_v30 = vsel %vm34_vm0, %v817_v29, 0.0 }
 0x1a2   :  { %383 = vadd.xlane.f32.xlu1 %v382_v30 }
 0x227   :  { %v375_v34 = vpop.xlane.xlu0 %374 }
 0x228   :  { %818 = vrcp.f32 %v375_v34 }
 0x22b   :  { %v378_v35 = vpop.xlane.xlu1 %377  ;;  %v381_v36 = vpop.xlane.xlu0 %380 }
 0x22c   :  { %820 = vrcp.f32 %v378_v35 }
 0x22d   :  { %822 = vrcp.f32 %v381_v36 }
 0x22f   :  { %v384_v37 = vpop.xlane.xlu1 %383 }
 0x230   :  { %824 = vrcp.f32 %v384_v37 }
 0x232   :  { %v819_v38 = vpop.eup %818 }
 0x233   :  { %v386_v39 = vmul.f32 %v819_v38, %v811_v23 }
 0x235   :  { %393 = vxpose.xlu0.b32.start [1/4] (short) (narrow) %v386_v39, 8  ;;  %v499_v16 = vsel %vm34_vm0, %v386_v39, 0.0 }
 0x236   :  { %v821_v1 = vpop.eup %820 }
 0x237   :  { %v823_v3 = vpop.eup %822  ;;  %v388_v6 = vmul.f32 %v821_v1, %v815_v26 }
 0x238   :  { %v390_v11 = vmul.f32 %v823_v3, %v813_v25 }
 0x239   :  { %v500_v40 = vsel %vm34_vm0, %v388_v6, 0.0  ;;  %394 = vxpose.xlu0.b32.cont [2/4] (short) (narrow) %v388_v6, 8 }
 0x23a   :  { %v825_v41 = vpop.eup %824  ;;  %v501_v42 = vadd.f32 %v500_v40, %v499_v16  ;;  %v502_v43 = vsel %vm34_vm0, %v390_v11, 0.0 }
 0x23b   :  { %v392_v44 = vmul.f32 %v825_v41, %v817_v29 }
 0x23c   :  { %v503_v45 = vadd.f32 %v502_v43, %v501_v42 }
 0x23d   :  { %395 = vxpose.xlu0.b32.cont [3/4] (short) (narrow) %v390_v11, 8  ;;  %v504_v46 = vsel %vm34_vm0, %v392_v44, 0.0 }
 0x23e   :  { %v505_v47 = vadd.f32 %v504_v46, %v503_v45 }
 0x240   :  { %v506_v57 = vrot.slane %v505_v47, 4 }
 0x241   :  { %396 = vxpose.xlu0.b32.end [4/4] (short) (narrow) %v392_v44, 8 }
 0x242   :  { %v507_v58 = vadd.f32 %v506_v57, %v505_v47 }
 0x244   :  { %v508_v4 = vrot.slane %v507_v58, 2 }
 0x246   :  { %v509_v5 = vadd.f32 %v508_v4, %v507_v58 }
 0x26a   :  { %807 = vset.pattern.permute.xlu0 %v837_v48 }
 0x2b5   :  { %v409_v49 = vpop.trf.xlu0 }
 0x2b6   :  { %760 = vmatmul.mubr.msk.f32.vlgmr.msra.gmra.mrb[4].mxu1 %vm425_vm2, %v409_v49  ;;  %771 = vmatmul.mubr.msk.f32.vlgmr.msra.gmra.mrb[6].mxu0 %vm425_vm2, %v409_v49 }
 0x2b7   :  { %796 = vmatpush3.bf16.msra.mxu1 %v795_v8  ;;  %781 = vmatprep.mubr.msk.f32.mxu1 %vm833_vm1, %v832_v18  ;;  %v510_v8 = vrot.slane %v509_v5, 1 }
 0x2b8   :  { %797 = vmatprep.subr.bf16.mxu1 %v835_v31 }
 0x2b9   :  { %v511_v59 = vadd.f32 %v510_v8, %v509_v5 }
 0x2bb   :  { %799 = vmatpush3.bf16.msra.mxu1 %v798_v50  ;;  %v512_v15 = vsel %vm34_vm0, %v511_v59, 0.0 }
 0x2be   :  { %782 = vmatmul.mubr.msk.f32.vlgmr.msra.gmra.mrb[6].mxu1 %vm425_vm2, %v409_v49 }
 0x389   :  { %v495_v51 = vpop.f32.mrb[4].mxu1  ;;  %v585_v52 = vpop.f32.mrb[6].mxu0 }
 0x38a   :  { %661 = vperm.xlu1 %806, %v495_v51   ;;  %v761_v53 = vpop.f32.mrb[5].mxu1  ;;  %v772_v54 = vpop.f32.mrb[7].mxu0 }
 0x391   :  { %v655_v55 = vpop.f32.mrb[6].mxu1 }
 0x392   :  { %v783_v56 = vpop.f32.mrb[7].mxu1 }
 0x3ae   :  { %513 = vadd.xlane.f32.xlu1 %v512_v15 }
 0x409   :  { %v662_v18 = vpop.permute.xlu1 %661 }
 0x40a   :  { %826 = vrcp.f32 %v662_v18 }
 0x414   :  { %v827_v19 = vpop.eup %826 }
 0x415   :  { %v665_v60 = vmul.f32 %v827_v19, %v585_v52  ;;  %v666_v61 = vmul.f32 %v827_v19, %v655_v55 }
 0x417   :  { %v667_v62 = vmul.f32 %v665_v60, %v665_v60  ;;  %670 = vst.msk [vmem:[%s991_s5] sm:$0xff] %vm34_vm0, %v665_v60 }
 0x419   :  { %v668_v63 = vsub.f32 %v666_v61, %v667_v62 }
 0x41b   :  { %v669_v0 = vmax.f32 %v668_v63, 0.0 }
 0x41d   :  { %v671_v2 = vadd.f32 1e-08, %v669_v0 }
 0x41f   :  { %828 = vlog2.f32 %v671_v2 }
 0x429   :  { %v829_v7 = vpop.eup %828 }
 0x42a   :  { %v673_v9 = vmul.f32 0.6931472, %v829_v7 }
 0x42c   :  { %674 = vst.msk [vmem:[%s992_s6] sm:$0xff] %vm34_vm0, %v673_v9 }
 0x43b   :  { %v514_v10 = vpop.xlane.xlu1 %513 }
 0x43c   :  { %830 = vrcp.f32 %v514_v10 }
 0x446   :  { %v831_v12 = vpop.eup %830 }
 0x447   :  { %v516_v13 = vmul.f32 %v831_v12, %v511_v59 }
 0x449   :  { %518 = vst.msk [vmem:[%s993_s4] sm:$0x1] %vm517_vm3, %v516_v13 }

// kernel: forward.9
= control target key start
LH: loop header
LB: loop body
LE: loop exit
PB: predicated region body
PF: predicated region fallthrough
CT: control target
= control target key end

     0   :  { %vm87_vm0 = vcmask 523264   ;;  %vm30_vm1 = vcmask 261120   ;;  %vm291_vm7 = vcmask 130048   ;;  %s940_s2 = inlined_call_operand.vmem [shape: f32[64,16], index: 2, kind: input, shape index: {}]   ;;  %s941_s1 = inlined_call_operand.vmem [shape: f32[32,64], index: 1, kind: input, shape index: {}]   ;;  %s942_s0 = inlined_call_operand.vmem [shape: f32[32,32], index: 0, kind: input, shape index: {}]   ;;  %s943_s3 = inlined_call_operand.vmem [shape: f32[16,16], index: 3, kind: input, shape index: {}]   ;;  %s944_s5 = inlined_call_operand.vmem [shape: f32[16,16], index: 5, kind: input, shape index: {}]   ;;  %s945_s4 = inlined_call_operand.vmem [shape: f32[1,16], index: 4, kind: input, shape index: {}]   ;;  %s946_s6 = inlined_call_operand.vmem [shape: f32[1,16], index: 6, kind: input, shape index: {}]   ;;  %s947_s7 = inlined_call_operand.vmem [shape: f32[32,16], index: 7, kind: output, shape index: {}]  }
   0x1   :  { %v79_v0 = vld [vmem:[%s940_s2] sm:$0xff]  ;;  %v80_v1 = vld [vmem:[%s940_s2 + $0x8] sm:$0xff]  ;;  %v81_v2 = vld [vmem:[%s940_s2 + $0x10] sm:$0xff] }
   0x2   :  { %v724_v3 = vpack.c.bf16 %v80_v1, %v79_v0  ;;  %v82_v4 = vld [vmem:[%s940_s2 + $0x18] sm:$0xff]  ;;  %v83_v6 = vld [vmem:[%s940_s2 + $0x20] sm:$0xff]  ;;  %v84_v7 = vld [vmem:[%s940_s2 + $0x28] sm:$0xff] }
   0x3   :  { %v728_v5 = vpack.c.bf16 %v82_v4, %v81_v2  ;;  %v75_v8 = vld [vmem:[%s941_s1] sm:$0xff]  ;;  %v850_v10 = vld [vmem:[%s942_s0 + $0x10] sm:$0xff]  ;;  %v855_v11 = vld [vmem:[%s942_s0 + $0x8] sm:$0xff]  ;;  %v732_v12 = vpack.c.bf16 %v84_v7, %v83_v6 }
   0x4   :  { %725 = vmatprep.subr.bf16.mxu0 %v724_v3  ;;  %670 = vmatprep.mubr.msk.f32.mxu0 %vm87_vm0, %v75_v8  ;;  %v26_v9 = vld [vmem:[%s942_s0] sm:$0xff]  ;;  %v37_v14 = vsel %vm30_vm1, %v850_v10, 0.0  ;;  %v34_v15 = vsel %vm30_vm1, %v855_v11, 0.0  ;;  %v865_v16 = vld [vmem:[%s942_s0 + $0x18] sm:$0xff]  ;;  %v85_v17 = vld [vmem:[%s940_s2 + $0x30] sm:$0xff] }
   0x5   :  { %727 = vmatpush3.bf16.msra.mxu0 %v724_v3  ;;  %v31_v13 = vsel %vm30_vm1, %v26_v9, 0.0  ;;  %v86_v18 = vld [vmem:[%s940_s2 + $0x38] sm:$0xff]  ;;  %38 = vadd.xlane.f32.xlu1 %v37_v14  ;;  %v40_v20 = vsel %vm30_vm1, %v865_v16, 0.0  ;;  %v76_v24 = vld [vmem:[%s941_s1 + $0x8] sm:$0xff]  ;;  %v77_v25 = vld [vmem:[%s941_s1 + $0x10] sm:$0xff] }
   0x6   :  { %729 = vmatprep.subr.bf16.mxu0 %v728_v5  ;;  %32 = vadd.xlane.f32.xlu0 %v31_v13  ;;  %v43_v19 = vadd.f32 %v34_v15, %v31_v13  ;;  %v736_v22 = vpack.c.bf16 %v86_v18, %v85_v17  ;;  %v78_v26 = vld [vmem:[%s941_s1 + $0x18] sm:$0xff]  ;;  %v282_v49 = vld [vmem:[%s943_s3] sm:$0xff]  ;;  %v283_v50 = vld [vmem:[%s943_s3 + $0x8] sm:$0xff] }
   0x7   :  { %v748_v57 = vpack.c.bf16 %v283_v50, %v282_v49  ;;  %v478_v4 = vld [vmem:[%s944_s5] sm:$0xff] }
   0x8   :  { %v44_v21 = vadd.f32 %v43_v19, %v37_v14  ;;  %v600_v7 = vld [vmem:[%s945_s4] ss:$0 sm:$0xff] }
   0x9   :  { %731 = vmatpush3.bf16.msra.mxu0 %v728_v5  ;;  %41 = vadd.xlane.f32.xlu1 %v40_v20  ;;  %v479_v5 = vld [vmem:[%s944_s5 + $0x8] sm:$0xff] }
   0xa   :  { %733 = vmatprep.subr.bf16.mxu0 %v732_v12  ;;  %35 = vadd.xlane.f32.xlu0 %v34_v15  ;;  %v45_v23 = vadd.f32 %v44_v21, %v40_v20  ;;  %v760_v6 = vpack.c.bf16 %v479_v5, %v478_v4 }
   0xc   :  { %v46_v27 = vrot.slane %v45_v23, 4 }
   0xd   :  { %735 = vmatpush3.bf16.msra.mxu0 %v732_v12 }
   0xe   :  { %737 = vmatprep.subr.bf16.mxu0 %v736_v22  ;;  %v47_v28 = vadd.f32 %v46_v27, %v45_v23 }
  0x10   :  { %v48_v29 = vrot.slane %v47_v28, 2 }
  0x11   :  { %739 = vmatpush3.bf16.msra.mxu0 %v736_v22 }
  0x12   :  { %v49_v30 = vadd.f32 %v48_v29, %v47_v28 }
  0x14   :  { %671 = vmatmul.mubr.msk.f32.vlgmr.msra.gmra.mrb[0].mxu0 %vm87_vm0, %v76_v24  ;;  %v50_v31 = vrot.slane %v49_v30, 1 }
  0x15   :  { %673 = vmatprep.mubr.msk.f32.mxu0 %vm87_vm0, %v77_v25 }
  0x16   :  { %v51_v32 = vadd.f32 %v50_v31, %v49_v30 }
  0x18   :  { %674 = vmatmul.mubr.msk.f32.gmra.mrb[2].mxu0 %vm87_vm0, %v78_v26  ;;  %764 = vrsqrt.f32 %v51_v32  ;;  %vm64_vm3 = vcmp.gt.f32.partialorder %v51_v32, 0.0  ;;  %v609_v26 = vld [vmem:[%s946_s6] ss:$0 sm:$0xff] }
  0x22   :  { %v765_v34 = vpop.eup %764 }
  0x23   :  { %v66_v37 = vsel %vm64_vm3, %v765_v34, 0.0 }
  0x92   :  { %v39_v40 = vpop.xlane.xlu1 %38 }
  0x93   :  { %v33_v33 = vpop.xlane.xlu0 %32  ;;  %vm54_vm5 = vcmp.gt.f32.partialorder %v39_v40, 0.0 }
  0x94   :  { %766 = vrsqrt.f32 %v33_v33  ;;  %vm52_vm2 = vcmp.gt.f32.partialorder %v33_v33, 0.0 }
  0x96   :  { %v42_v42 = vpop.xlane.xlu1 %41 }
  0x97   :  { %v36_v41 = vpop.xlane.xlu0 %35  ;;  %vm55_vm6 = vcmp.gt.f32.partialorder %v42_v42, 0.0 }
  0x98   :  { %768 = vrsqrt.f32 %v36_v41  ;;  %vm53_vm4 = vcmp.gt.f32.partialorder %v36_v41, 0.0 }
  0x99   :  { %770 = vrsqrt.f32 %v39_v40 }
  0x9a   :  { %772 = vrsqrt.f32 %v42_v42 }
  0x9e   :  { %v767_v35 = vpop.eup %766 }
  0x9f   :  { %v60_v36 = vsel %vm52_vm2, %v767_v35, 0.0 }
  0xa0   :  { %v67_v38 = vmul.f32 %v60_v36, %v26_v9 }
  0xa2   :  { %v71_v39 = vmul.f32 %v67_v38, %v66_v37  ;;  %v769_v43 = vpop.eup %768 }
  0xa3   :  { %v771_v45 = vpop.eup %770  ;;  %v61_v48 = vsel %vm53_vm4, %v769_v43, 0.0 }
  0xa4   :  { %684 = vmatprep.mubr.msk.f32.mxu1 %vm30_vm1, %v71_v39  ;;  %708 = vmatprep.mubr.msk.f32.mxu0 %vm30_vm1, %v71_v39  ;;  %v773_v51 = vpop.eup %772  ;;  %v62_v52 = vsel %vm54_vm5, %v771_v45, 0.0  ;;  %v68_v55 = vmul.f32 %v61_v48, %v855_v11 }
  0xa5   :  { %v69_v58 = vmul.f32 %v62_v52, %v850_v10  ;;  %v63_v59 = vsel %vm55_vm6, %v773_v51, 0.0 }
  0xa6   :  { %v72_v60 = vmul.f32 %v68_v55, %v66_v37  ;;  %v70_v61 = vmul.f32 %v63_v59, %v865_v16 }
  0xa7   :  { %v73_v62 = vmul.f32 %v69_v58, %v66_v37 }
  0xa8   :  { %v74_v63 = vmul.f32 %v70_v61, %v66_v37 }
  0xe7   :  { %v672_v44 = vpop.f32.mrb[0].mxu0 }
  0xe8   :  { %v166_v46 = vpop.f32.mrb[1].mxu0 }
  0xe9   :  { %v740_v47 = vpack.c.bf16 %v672_v44, %v166_v46 }
  0xeb   :  { %v675_v53 = vpop.f32.mrb[2].mxu0  ;;  %741 = vmatprep.subr.bf16.mxu1 %v740_v47 }
  0xec   :  { %v176_v54 = vpop.f32.mrb[3].mxu0  ;;  %743 = vmatpush3.bf16.msra.mxu1 %v740_v47 }
  0xed   :  { %v744_v56 = vpack.c.bf16 %v675_v53, %v176_v54 }
  0xef   :  { %745 = vmatprep.subr.bf16.mxu1 %v744_v56 }
  0xf0   :  { %747 = vmatpush3.bf16.msra.mxu1 %v744_v56 }
  0xf1   :  { %749 = vmatprep.subr.bf16.mxu1 %v748_v57 }
  0xf3   :  { %685 = vmatmul.mubr.msk.f32.vlgmr.msra.gmra.mrb[0].mxu1 %vm30_vm1, %v72_v60 }
  0xf4   :  { %687 = vmatprep.mubr.msk.f32.mxu1 %vm30_vm1, %v73_v62  ;;  %751 = vmatpush3.bf16.msra.mxu1 %v748_v57 }
  0xf5   :  { %761 = vmatprep.subr.bf16.mxu1 %v760_v6 }
  0xf7   :  { %688 = vmatmul.mubr.msk.f32.gmra.mrb[2].mxu1 %vm30_vm1, %v74_v63 }
 0x1c6   :  { %v686_v0 = vpop.f32.mrb[0].mxu1 }
 0x1c7   :  { %v263_v1 = vpop.f32.mrb[1].mxu1 }
 0x1c8   :  { %694 = vmatprep.mubr.msk.f32.mxu1 %vm291_vm7, %v263_v1 }
 0x1c9   :  { %695 = vmatmul.mubr.msk.f32.vlgmr.msra.gmra.mrb[4].mxu1 %vm291_vm7, %v686_v0 }
 0x1ca   :  { %v689_v2 = vpop.f32.mrb[2].mxu1  ;;  %763 = vmatpush3.bf16.msra.mxu1 %v760_v6 }
 0x1cb   :  { %v273_v3 = vpop.f32.mrb[3].mxu1 }
 0x1cc   :  { %697 = vmatprep.mubr.msk.f32.mxu1 %vm291_vm7, %v273_v3 }
 0x1cd   :  { %698 = vmatmul.mubr.msk.f32.gmra.mrb[6].mxu1 %vm291_vm7, %v689_v2 }
 0x29c   :  { %v696_v8 = vpop.f32.mrb[4].mxu1 }
 0x29d   :  { %v376_v9 = vadd.f32 %v696_v8, %v600_v7  ;;  %v370_v10 = vpop.f32.mrb[5].mxu1 }
 0x29e   :  { %v371_v11 = vadd.f32 %v600_v7, %v370_v10 }
 0x29f   :  { %774 = vtanh.f32 %v376_v9 }
 0x2a0   :  { %776 = vtanh.f32 %v371_v11  ;;  %v699_v12 = vpop.f32.mrb[6].mxu1 }
 0x2a1   :  { %v386_v13 = vadd.f32 %v699_v12, %v600_v7  ;;  %v380_v14 = vpop.f32.mrb[7].mxu1 }
 0x2a2   :  { %v381_v15 = vadd.f32 %v600_v7, %v380_v14 }
 0x2a3   :  { %778 = vtanh.f32 %v386_v13 }
 0x2a4   :  { %780 = vtanh.f32 %v381_v15 }
 0x2a9   :  { %v775_v16 = vpop.eup %774 }
 0x2aa   :  { %v777_v17 = vpop.eup %776 }
 0x2ab   :  { %v752_v18 = vpack.c.bf16 %v775_v16, %v777_v17 }
 0x2ad   :  { %v779_v19 = vpop.eup %778  ;;  %753 = vmatprep.subr.bf16.mxu0 %v752_v18 }
 0x2ae   :  { %v781_v20 = vpop.eup %780  ;;  %755 = vmatpush3.bf16.msra.mxu0 %v752_v18 }
 0x2af   :  { %v756_v21 = vpack.c.bf16 %v779_v19, %v781_v20 }
 0x2b1   :  { %757 = vmatprep.subr.bf16.mxu0 %v756_v21 }
 0x2b2   :  { %759 = vmatpush3.bf16.msra.mxu0 %v756_v21 }
 0x2b5   :  { %709 = vmatmul.mubr.msk.f32.vlgmr.msra.gmra.mrb[4].mxu0 %vm30_vm1, %v72_v60 }
 0x2b6   :  { %711 = vmatprep.mubr.msk.f32.mxu0 %vm30_vm1, %v73_v62 }
 0x2b9   :  { %712 = vmatmul.mubr.msk.f32.gmra.mrb[6].mxu0 %vm30_vm1, %v74_v63 }
 0x388   :  { %v710_v22 = vpop.f32.mrb[4].mxu0 }
 0x389   :  { %v459_v23 = vpop.f32.mrb[5].mxu0 }
 0x38a   :  { %718 = vmatprep.mubr.msk.f32.mxu1 %vm291_vm7, %v459_v23 }
 0x38b   :  { %719 = vmatmul.mubr.msk.f32.vlgmr.msra.gmra.mrb[8].mxu1 %vm291_vm7, %v710_v22 }
 0x38c   :  { %v713_v24 = vpop.f32.mrb[6].mxu0 }
 0x38d   :  { %v469_v25 = vpop.f32.mrb[7].mxu0 }
 0x38e   :  { %721 = vmatprep.mubr.msk.f32.mxu1 %vm291_vm7, %v469_v25 }
 0x38f   :  { %722 = vmatmul.mubr.msk.f32.gmra.mrb[10].mxu1 %vm291_vm7, %v713_v24 }
 0x45e   :  { %v720_v27 = vpop.f32.mrb[8].mxu1 }
 0x45f   :  { %v571_v28 = vadd.f32 %v720_v27, %v609_v26  ;;  %v565_v29 = vpop.f32.mrb[9].mxu1 }
 0x460   :  { %v566_v30 = vadd.f32 %v609_v26, %v565_v29 }
 0x461   :  { %585 = vst.msk [vmem:[%s947_s7 + $0x8] sm:$0xff] %vm291_vm7, %v571_v28 }
 0x462   :  { %584 = vst.msk [vmem:[%s947_s7] sm:$0xff] %vm291_vm7, %v566_v30  ;;  %v723_v31 = vpop.f32.mrb[10].mxu1 }
 0x463   :  { %v581_v32 = vadd.f32 %v723_v31, %v609_v26  ;;  %v575_v33 = vpop.f32.mrb[11].mxu1 }
 0x464   :  { %v576_v34 = vadd.f32 %v609_v26, %v575_v33 }
 0x465   :  { %587 = vst.msk [vmem:[%s947_s7 + $0x18] sm:$0xff] %vm291_vm7, %v581_v32 }
 0x466   :  { %586 = vst.msk [vmem:[%s947_s7 + $0x10] sm:$0xff] %vm291_vm7, %v576_v34 }

// kernel: forward.14
= control target key start
LH: loop header
LB: loop body
LE: loop exit
PB: predicated region body
PF: predicated region fallthrough
CT: control target
= control target key end

     0   :  { %v291_v0 = vmov 0.0|0.0   ;;  %vm292_vm0 = vmmov 0   ;;  %v293_v4 = vmov 0.0   ;;  %vm24_vm1 = vcmask 261120   ;;  %s376_s1 = inlined_call_operand.vmem [shape: f32[64,32], index: 1, kind: input, shape index: {}]   ;;  %s377_s0 = inlined_call_operand.vmem [shape: f32[8,64], index: 0, kind: input, shape index: {}]   ;;  %s378_s3 = inlined_call_operand.vmem [shape: f32[32,32], index: 3, kind: input, shape index: {}]   ;;  %s379_s2 = inlined_call_operand.vmem [shape: f32[1,32], index: 2, kind: input, shape index: {}]   ;;  %s380_s4 = inlined_call_operand.vmem [shape: f32[1,32], index: 4, kind: input, shape index: {}]   ;;  %s381_s5 = inlined_call_operand.vmem [shape: f32[8,32], index: 5, kind: output, shape index: {}]  }
   0x1   :  { %266 = vmatprep.subr.bf16.mxu0 %v291_v0  ;;  %v28_v1 = vld [vmem:[%s376_s1] sm:$0xff]  ;;  %v29_v2 = vld [vmem:[%s376_s1 + $0x8] sm:$0xff]  ;;  %v30_v3 = vld [vmem:[%s376_s1 + $0x10] sm:$0xff]  ;;  %252 = vmatprep.mubr.msk.f32.mxu0 %vm292_vm0, %v293_v4  ;;  %25 = vst.msk [vmem:[#allocation2] sm:$0xff] %vm24_vm1, %v293_v4  ;;  %vm36_vm2 = vcmask 523264  }
   0x2   :  { %v267_v5 = vpack.c.bf16 %v29_v2, %v28_v1  ;;  %v31_v6 = vld [vmem:[%s376_s1 + $0x18] sm:$0xff]  ;;  %278 = vmatprep.subr.bf16.mxu1 %v291_v0  ;;  %263 = vmatprep.mubr.msk.f32.mxu1 %vm292_vm0, %v293_v4  ;;  %v32_v8 = vld [vmem:[%s376_s1 + $0x20] sm:$0xff]  ;;  %v33_v9 = vld [vmem:[%s376_s1 + $0x28] sm:$0xff] }
   0x3   :  { %v270_v7 = vpack.c.bf16 %v31_v6, %v30_v3  ;;  %v273_v10 = vpack.c.bf16 %v33_v9, %v32_v8  ;;  %v34_v11 = vld [vmem:[%s376_s1 + $0x30] sm:$0xff]  ;;  %v35_v12 = vld [vmem:[%s376_s1 + $0x38] sm:$0xff]  ;;  %v27_v14 = vld [vmem:[%s377_s0] sm:$0xff] }
   0x4   :  { %268 = vmatpush3.bf16.msra.mxu0 %v267_v5  ;;  %v276_v13 = vpack.c.bf16 %v35_v12, %v34_v11  ;;  %v127_v15 = vld [vmem:[%s378_s3] sm:$0xff]  ;;  %v128_v16 = vld [vmem:[%s378_s3 + $0x8] sm:$0xff]  ;;  %v129_v17 = vld [vmem:[%s378_s3 + $0x10] sm:$0xff] }
   0x5   :  { %269 = vmatprep.subr.bf16.mxu0 %v291_v0  ;;  %v279_v18 = vpack.c.bf16 %v128_v16, %v127_v15  ;;  %v130_v19 = vld [vmem:[%s378_s3 + $0x18] sm:$0xff]  ;;  %v219_v25 = vld [vmem:[%s379_s2] ss:$0 sm:$0xff] }
   0x6   :  { %v282_v20 = vpack.c.bf16 %v130_v19, %v129_v17  ;;  %v220_v30 = vld [vmem:[%s380_s4] ss:$0 sm:$0xff] }
   0x7   :  { %280 = vmatpush3.bf16.msra.mxu1 %v279_v18 }
   0x8   :  { %271 = vmatpush3.bf16.msra.mxu0 %v270_v7  ;;  %281 = vmatprep.subr.bf16.mxu1 %v291_v0  ;;  %v26_v21 = vld [vmem:[#allocation2] sm:$0xff] }
   0x9   :  { %272 = vmatprep.subr.bf16.mxu0 %v291_v0 }
   0xb   :  { %283 = vmatpush3.bf16.msra.mxu1 %v282_v20 }
   0xc   :  { %274 = vmatpush3.bf16.msra.mxu0 %v273_v10 }
   0xd   :  { %275 = vmatprep.subr.bf16.mxu0 %v291_v0 }
  0x10   :  { %277 = vmatpush3.bf16.msra.mxu0 %v276_v13 }
  0x13   :  { %253 = vmatmul.mubr.msk.f32.vlgmr.msra.gmra.mrb[0].mxu0 %vm36_vm2, %v27_v14 }
  0xe6   :  { %v106_v22 = vpop.f32.mrb[0].mxu0 }
  0xe7   :  { %v110_v23 = vadd.f32 %v106_v22, %v26_v21  ;;  %v254_v24 = vpop.f32.mrb[1].mxu0 }
  0xe9   :  { %112 = vst.msk [vmem:[#allocation2] sm:$0xff] %vm24_vm1, %v110_v23 }
  0xf0   :  { %v116_v26 = vld [vmem:[#allocation2] sm:$0xff] }
  0xf1   :  { %v124_v27 = vadd.f32 %v219_v25, %v116_v26 }
  0xf3   :  { %v125_v28 = vmul.f32 0.999995, %v124_v27 }
  0xf5   :  { %287 = vtanh.f32 %v125_v28 }
  0xff   :  { %v288_v29 = vpop.eup %287 }
 0x100   :  { %264 = vmatmul.mubr.msk.f32.vlgmr.msra.gmra.mrb[0].mxu1 %vm24_vm1, %v288_v29 }
 0x1d3   :  { %v207_v31 = vpop.f32.mrb[0].mxu1 }
 0x1d4   :  { %v208_v32 = vadd.f32 %v220_v30, %v207_v31  ;;  %v265_v33 = vpop.f32.mrb[1].mxu1 }
 0x1d6   :  { %v211_v34 = vmul.f32 0.999995, %v208_v32 }
 0x1d8   :  { %289 = vtanh.f32 %v211_v34 }
 0x1e2   :  { %v290_v35 = vpop.eup %289 }
 0x1e3   :  { %213 = vst.msk [vmem:[%s381_s5] sm:$0xff] %vm24_vm1, %v290_v35 }

// kernel: forward.15
= control target key start
LH: loop header
LB: loop body
LE: loop exit
PB: predicated region body
PF: predicated region fallthrough
CT: control target
= control target key end

     0   :  { %vm55_vm0 = vcmask 261120   ;;  %v727_v4 = vmov 0.0|0.0   ;;  %vm728_vm1 = vmmov 0   ;;  %v729_v8 = vmov 0.0   ;;  %s930_s0 = inlined_call_operand.vmem [shape: f32[8,32], index: 0, kind: input, shape index: {}]   ;;  %s931_s1 = inlined_call_operand.vmem [shape: f32[1,32], index: 1, kind: input, shape index: {}]   ;;  %s932_s2 = inlined_call_operand.vmem [shape: f32[32,32], index: 2, kind: input, shape index: {}]   ;;  %s933_s4 = inlined_call_operand.vmem [shape: f32[32,16], index: 4, kind: input, shape index: {}]   ;;  %s934_s7 = inlined_call_operand.vmem [shape: f32[8,32], index: 7, kind: input, shape index: {}]   ;;  %s935_s3 = inlined_call_operand.vmem [shape: f32[1,32], index: 3, kind: input, shape index: {}]   ;;  %s936_s6 = inlined_call_operand.vmem [shape: f32[32,32], index: 6, kind: input, shape index: {}]   ;;  %s937_s5 = inlined_call_operand.vmem [shape: f32[1,16], index: 5, kind: input, shape index: {}]   ;;  %s938_s13 = inlined_call_operand.vmem [shape: f32[1,16], index: 13, kind: output, shape index: {0}]   ;;  %s939_s9 = inlined_call_operand.vmem [shape: f32[32,32], index: 9, kind: input, shape index: {}]   ;;  %s940_s8 = inlined_call_operand.vmem [shape: f32[1,32], index: 8, kind: input, shape index: {}]   ;;  %s941_s11 = inlined_call_operand.vmem [shape: f32[32,16], index: 11, kind: input, shape index: {}]   ;;  %s942_s10 = inlined_call_operand.vmem [shape: f32[1,32], index: 10, kind: input, shape index: {}]   ;;  %s943_s12 = inlined_call_operand.vmem [shape: f32[1,16], index: 12, kind: input, shape index: {}]   ;;  %s944_s14 = inlined_call_operand.vmem [shape: f32[8,16], index: 14, kind: output, shape index: {1}]  }
   0x1   :  { %v808_v0 = vld [vmem:[%s930_s0] sm:$0xff]  ;;  %684 = vmatprep.subr.bf16.mxu0 %v727_v4  ;;  %v85_v6 = vld [vmem:[%s932_s2 + $0x8] sm:$0xff]  ;;  %v86_v7 = vld [vmem:[%s932_s2 + $0x10] sm:$0xff]  ;;  %632 = vmatprep.mubr.msk.f32.mxu0 %vm728_vm1, %v729_v8  ;;  %vm241_vm2 = vcmask 122880   ;;  %vm248_vm3 = vcmask 64512   ;;  %vm577_vm4 = vcmask 130048  }
   0x2   :  { %v587_v1 = vld [vmem:[%s931_s1] ss:$0 sm:$0xff]  ;;  %v87_v10 = vld [vmem:[%s932_s2 + $0x18] sm:$0xff]  ;;  %690 = vmatprep.subr.bf16.mxu1 %v727_v4  ;;  %643 = vmatprep.mubr.msk.f32.mxu1 %vm728_vm1, %v729_v8  ;;  %v164_v39 = vld [vmem:[%s933_s4 + $0x8] sm:$0xff] }
   0x3   :  { %v54_v2 = vmul.f32 %v587_v1, %v808_v0  ;;  %v84_v5 = vld [vmem:[%s932_s2] sm:$0xff]  ;;  %v688_v11 = vpack.c.bf16 %v87_v10, %v86_v7  ;;  %v165_v40 = vld [vmem:[%s933_s4 + $0x10] sm:$0xff]  ;;  %v166_v42 = vld [vmem:[%s933_s4 + $0x18] sm:$0xff] }
   0x4   :  { %v685_v9 = vpack.c.bf16 %v85_v6, %v84_v5  ;;  %v163_v38 = vld [vmem:[%s933_s4] sm:$0xff]  ;;  %v694_v43 = vpack.c.bf16 %v166_v42, %v165_v40  ;;  %v244_v50 = vld [vmem:[%s936_s6 + $0x8] sm:$0xff]  ;;  %v245_v53 = vld [vmem:[%s936_s6 + $0x10] sm:$0xff]  ;;  %v322_v5 = vlaneseq }
   0x5   :  { %v56_v3 = vsel %vm55_vm0, %v54_v2, 0.0  ;;  %v691_v41 = vpack.c.bf16 %v164_v39, %v163_v38  ;;  %v247_v44 = vld [vmem:[%s934_s7] sm:$0xff]  ;;  %v246_v54 = vld [vmem:[%s936_s6 + $0x18] sm:$0xff]  ;;  %v409_v63 = vld [vmem:[%s939_s9 + $0x8] sm:$0xff] }
   0x6   :  { %57 = vadd.xlane.f32.xlu0 %v56_v3  ;;  %686 = vmatpush3.bf16.msra.mxu0 %v685_v9  ;;  %v88_v45 = vld [vmem:[%s935_s3] sm:$0x1]  ;;  %v700_v55 = vpack.c.bf16 %v246_v54, %v245_v53  ;;  %v411_v2 = vld [vmem:[%s939_s9 + $0x18] sm:$0xff]  ;;  %v323_v6 = vshrl.u32 %v322_v5, 7 }
   0x7   :  { %687 = vmatprep.subr.bf16.mxu0 %v727_v4  ;;  %692 = vmatpush3.bf16.msra.mxu1 %v691_v41  ;;  %v243_v49 = vld [vmem:[%s936_s6] sm:$0xff] }
   0x8   :  { %693 = vmatprep.subr.bf16.mxu1 %v727_v4  ;;  %v697_v51 = vpack.c.bf16 %v244_v50, %v243_v49  ;;  %v167_v56 = vld [vmem:[%s937_s5] sm:$0x1]  ;;  %v324_v7 = vsub.s32 0, %v323_v6 }
   0x9   :  { %v408_v62 = vld [vmem:[%s939_s9] sm:$0xff] }
   0xa   :  { %689 = vmatpush3.bf16.msra.mxu0 %v688_v11  ;;  %v703_v1 = vpack.c.bf16 %v409_v63, %v408_v62  ;;  %v592_v11 = vld [vmem:[%s940_s8] ss:$0 sm:$0xff] }
   0xb   :  { %646 = vmatprep.subr.mxu0 %v729_v8  ;;  %695 = vmatpush3.bf16.msra.mxu1 %v694_v43 }
   0xc   :  { %696 = vmatprep.subr.bf16.mxu1 %v727_v4 }
  0x93   :  { %v58_v12 = vpop.xlane.xlu0 %57 }
  0x94   :  { %v59_v13 = vrot.slane %v58_v12, 4 }
  0x96   :  { %v60_v14 = vmax.f32 %v58_v12, %v59_v13 }
  0x98   :  { %v61_v15 = vrot.slane %v60_v14, 2 }
  0x9a   :  { %v62_v16 = vmax.f32 %v60_v14, %v61_v15  ;;  %v493_v15 = vld [vmem:[%s941_s11] sm:$0xff] }
  0x9c   :  { %v63_v17 = vrot.slane %v62_v16, 1 }
  0x9e   :  { %v64_v18 = vmax.f32 %v62_v16, %v63_v17  ;;  %v494_v16 = vld [vmem:[%s941_s11 + $0x8] sm:$0xff]  ;;  %v495_v17 = vld [vmem:[%s941_s11 + $0x10] sm:$0xff] }
  0xa0   :  { %v65_v19 = vsub.f32 %v58_v12, %v64_v18  ;;  %v709_v18 = vpack.c.bf16 %v494_v16, %v493_v15 }
  0xa2   :  { %v66_v20 = vmul.f32 1.442695, %v65_v19  ;;  %v496_v19 = vld [vmem:[%s941_s11 + $0x18] sm:$0xff] }
  0xa4   :  { %717 = vpow2.f32 %v66_v20  ;;  %v712_v20 = vpack.c.bf16 %v496_v19, %v495_v17 }
  0xae   :  { %v718_v21 = vpop.eup %717 }
  0xaf   :  { %v68_v22 = vrot.slane %v718_v21, 4 }
  0xb1   :  { %v69_v23 = vadd.f32 %v718_v21, %v68_v22 }
  0xb3   :  { %v70_v24 = vrot.slane %v69_v23, 2 }
  0xb5   :  { %v71_v25 = vadd.f32 %v70_v24, %v69_v23 }
  0xb7   :  { %v72_v26 = vrot.slane %v71_v25, 1 }
  0xb9   :  { %v73_v27 = vadd.f32 %v72_v26, %v71_v25  ;;  %v595_v26 = vld [vmem:[%s943_s12] ss:$0 sm:$0xff] }
  0xbb   :  { %719 = vrcp.f32 %v73_v27 }
  0xc5   :  { %v720_v28 = vpop.eup %719 }
  0xc6   :  { %v75_v29 = vmul.f32 %v720_v28, %v718_v21  ;;  %v593_v21 = vld [vmem:[%s942_s10] ss:$0 sm:$0xff] }
  0xc8   :  { %v76_v30 = vmul.f32 %v75_v29, %v808_v0 }
  0xca   :  { %v77_v31 = vsel %vm55_vm0, %v76_v30, 0.0 }
  0xcb   :  { %v78_v32 = vrot.slane %v77_v31, 4 }
  0xcd   :  { %v79_v33 = vadd.f32 %v78_v32, %v77_v31 }
  0xcf   :  { %v80_v34 = vrot.slane %v79_v33, 2 }
  0xd1   :  { %v81_v35 = vadd.f32 %v80_v34, %v79_v33 }
  0xd3   :  { %v82_v36 = vrot.slane %v81_v35, 1 }
  0xd5   :  { %v83_v37 = vadd.f32 %v82_v36, %v81_v35 }
  0xd7   :  { %633 = vmatmul.mubr.msk.f32.vlgmr.msra.gmra.mrb[0].mxu0 %vm55_vm0, %v83_v37 }
  0xd8   :  { %648 = vmatprep.mubr.msk.f32.mxu0 %vm728_vm1, %v729_v8  ;;  %647 = vmatpush3.msra.mxu0 %v247_v44 }
  0xd9   :  { %702 = vmatprep.subr.bf16.mxu0 %v727_v4 }
 0x1aa   :  { %v158_v46 = vpop.f32.mrb[0].mxu0 }
 0x1ab   :  { %v159_v47 = vadd.f32 %v158_v46, %v88_v45  ;;  %v634_v48 = vpop.f32.mrb[1].mxu0 }
 0x1ad   :  { %721 = vtanh.f32 %v159_v47 }
 0x1b7   :  { %v722_v52 = vpop.eup %721 }
 0x1b8   :  { %644 = vmatmul.mubr.msk.f32.vlgmr.msra.gmra.mrb[0].mxu1 %vm55_vm0, %v722_v52 }
 0x1b9   :  { %698 = vmatpush3.bf16.msra.mxu1 %v697_v51  ;;  %659 = vmatprep.mubr.msk.f32.mxu1 %vm728_vm1, %v729_v8 }
 0x1ba   :  { %699 = vmatprep.subr.bf16.mxu1 %v727_v4 }
 0x1bd   :  { %701 = vmatpush3.bf16.msra.mxu1 %v700_v55 }
 0x1be   :  { %708 = vmatprep.subr.bf16.mxu1 %v727_v4 }
 0x1c0   :  { %660 = vmatmul.mubr.msk.f32.vlgmr.msra.gmra.mrb[2].mxu1 %vm55_vm0, %v808_v0  ;;  %v410_v0 = vld [vmem:[%s939_s9 + $0x10] sm:$0xff] }
 0x1c1   :  { %681 = vmatprep.mubr.msk.f32.mxu1 %vm728_vm1, %v729_v8  ;;  %v706_v3 = vpack.c.bf16 %v411_v2, %v410_v0  ;;  %710 = vmatpush3.bf16.msra.mxu1 %v709_v18 }
 0x1c2   :  { %711 = vmatprep.subr.bf16.mxu1 %v727_v4 }
 0x1c5   :  { %713 = vmatpush3.bf16.msra.mxu1 %v712_v20 }
 0x28b   :  { %v237_v57 = vpop.f32.mrb[0].mxu1 }
 0x28c   :  { %v238_v58 = vadd.f32 %v237_v57, %v167_v56  ;;  %v645_v59 = vpop.f32.mrb[1].mxu1 }
 0x28e   :  { %242 = vst.msk [vmem:[%s938_s13] sm:$0x1] %vm241_vm2, %v238_v58  ;;  %649 = vmatmul.mubr.msk.f32.vlgmr.msra.gmra.mrb[2].mxu0 %vm248_vm3, %v238_v58 }
 0x28f   :  { %670 = vmatprep.mubr.msk.f32.mxu0 %vm728_vm1, %v729_v8  ;;  %704 = vmatpush3.bf16.msra.mxu0 %v703_v1 }
 0x290   :  { %705 = vmatprep.subr.bf16.mxu0 %v727_v4 }
 0x293   :  { %v395_v60 = vpop.f32.mrb[2].mxu1  ;;  %707 = vmatpush3.bf16.msra.mxu0 %v706_v3 }
 0x294   :  { %v661_v61 = vpop.f32.mrb[3].mxu1 }
 0x361   :  { %v318_v8 = vpop.f32.mrb[2].mxu0 }
 0x362   :  { %v325_v9 = vrot.slane %v318_v8, %v324_v7  ;;  %v650_v10 = vpop.f32.mrb[3].mxu0 }
 0x364   :  { %v396_v12 = vadd.f32 %v395_v60, %v325_v9 }
 0x366   :  { %v406_v13 = vadd.f32 %v592_v11, %v396_v12 }
 0x368   :  { %723 = vtanh.f32 %v406_v13 }
 0x372   :  { %v724_v14 = vpop.eup %723 }
 0x373   :  { %671 = vmatmul.mubr.msk.f32.vlgmr.msra.gmra.mrb[4].mxu0 %vm55_vm0, %v724_v14 }
 0x446   :  { %v488_v22 = vpop.f32.mrb[4].mxu0 }
 0x447   :  { %v489_v23 = vadd.f32 %v593_v21, %v488_v22  ;;  %v672_v24 = vpop.f32.mrb[5].mxu0 }
 0x449   :  { %725 = vtanh.f32 %v489_v23 }
 0x453   :  { %v726_v25 = vpop.eup %725 }
 0x454   :  { %682 = vmatmul.mubr.msk.f32.vlgmr.msra.gmra.mrb[4].mxu1 %vm55_vm0, %v726_v25 }
 0x527   :  { %v573_v27 = vpop.f32.mrb[4].mxu1 }
 0x528   :  { %v574_v28 = vadd.f32 %v595_v26, %v573_v27  ;;  %v683_v4 = vpop.f32.mrb[5].mxu1 }
 0x52a   :  { %578 = vst.msk [vmem:[%s944_s14] sm:$0xff] %vm577_vm4, %v574_v28 }

// kernel: forward.16
= control target key start
LH: loop header
LB: loop body
LE: loop exit
PB: predicated region body
PF: predicated region fallthrough
CT: control target
= control target key end

     0   :  { %vm26_vm0 = vcmask 64512   ;;  %s723_s0 = inlined_call_operand.vmem [shape: f32[32,8], index: 0, kind: input, shape index: {}]   ;;  %s724_s1 = inlined_call_operand.vmem [shape: f32[32,64], index: 1, kind: input, shape index: {}]   ;;  %s725_s2 = inlined_call_operand.vmem [shape: f32[8,8], index: 2, kind: input, shape index: {}]   ;;  %s726_s3 = inlined_call_operand.vmem [shape: f32[8,64], index: 3, kind: input, shape index: {}]   ;;  %s727_s4 = inlined_call_operand.hbm [shape: f32[1,1], index: 4, kind: output, shape index: {}]  }
   0x1   :  { %v623_v0 = vld [vmem:[%s723_s0 + $0x10] sm:$0xff]  ;;  %v628_v1 = vld [vmem:[%s723_s0] sm:$0xff]  ;;  %v633_v2 = vld [vmem:[%s723_s0 + $0x18] sm:$0xff] }
   0x2   :  { %v24_v3 = vmul.f32 %v623_v0, %v623_v0  ;;  %v22_v4 = vmul.f32 %v628_v1, %v628_v1  ;;  %v25_v5 = vmul.f32 %v633_v2, %v633_v2  ;;  %v644_v6 = vld [vmem:[%s723_s0 + $0x8] sm:$0xff] }
   0x3   :  { %v23_v7 = vmul.f32 %v644_v6, %v644_v6 }
   0x4   :  { %v33_v8 = vsel %vm26_vm0, %v24_v3, 0.0  ;;  %v27_v9 = vsel %vm26_vm0, %v22_v4, 0.0 }
   0x5   :  { %9 = vsyncpa [#allocation3], 0  ;;  %34 = vadd.xlane.f32.xlu1 %v33_v8  ;;  %28 = vadd.xlane.f32.xlu0 %v27_v9  ;;  %v36_v10 = vsel %vm26_vm0, %v25_v5, 0.0  ;;  %v30_v11 = vsel %vm26_vm0, %v23_v7, 0.0  ;;  %v288_v12 = vld [vmem:[%s725_s2] sm:$0xff]  ;;  %v123_v15 = vld [vmem:[%s724_s1 + $0x8] sm:$0xff] }
   0x6   :  { %v289_v13 = vsel %vm26_vm0, %v288_v12, -inf  ;;  %v122_v14 = vld [vmem:[%s724_s1] sm:$0xff]  ;;  %v124_v16 = vld [vmem:[%s724_s1 + $0x10] sm:$0xff]  ;;  %v125_v17 = vld [vmem:[%s724_s1 + $0x18] sm:$0xff]  ;;  %vm158_vm9 = vcmask 261120   ;;  %vm592_vm10 = vmmov 0  }
   0x7   :  { %vm694_vm11 = vmpackc.low %vm26_vm0, %vm26_vm0  ;;  %vm402_vm12 = vcmask 523264   ;;  %s594_s6 = smov [#allocation2]   ;;  %vm414_vm13 = vcmask 0  }
   0x8   :  { %s422_s7 = sshll.u32 %s594_s6, 4  ;;  %s423_s7 = int_to_ptr.vmem [resolvable:$true] %s422_s7 }
   0x9   :  { %37 = vadd.xlane.f32.xlu1 %v36_v10  ;;  %31 = vadd.xlane.f32.xlu0 %v30_v11  ;;  %s567_s8 = scalar_lea.vmem %s423_s7, 16  ;;  %p572_p1 = scmp.lt.s32.totalorder %s423_s7, %s423_s7 }
   0xa   :  { %p568_p0 = scmp.ne.s32.totalorder %s423_s7, %s567_s8 }
   0xd   :  { %290 = vmax.xlane.f32.xlu1 %v289_v13 }
  0x36   :  { %126 = vxpose.xlu0.b32.start [1/4] (short) (narrow) %v122_v14, 64 }
  0x3a   :  { %127 = vxpose.xlu0.b32.cont [2/4] (short) (narrow) %v123_v15, 64 }
  0x3e   :  { %128 = vxpose.xlu0.b32.cont [3/4] (short) (narrow) %v124_v16, 64 }
  0x42   :  { %129 = vxpose.xlu0.b32.end [4/4] (short) (narrow) %v125_v17, 64 }
  0x92   :  { %v35_v18 = vpop.xlane.xlu1 %34  ;;  %v29_v19 = vpop.xlane.xlu0 %28 }
  0x93   :  { %535 = vrsqrt.f32 %v35_v18  ;;  %vm55_vm1 = vcmp.eq.f32.partialorder %v35_v18, inf  ;;  %v58_v28 = vand.u32 2147483648, %v35_v18  ;;  %vm57_vm2 = vcmp.eq.f32.partialorder %v35_v18, 0.0 }
  0x94   :  { %537 = vrsqrt.f32 %v29_v19  ;;  %vm41_vm3 = vcmp.eq.f32.partialorder %v29_v19, inf  ;;  %v44_v31 = vand.u32 2147483648, %v29_v19  ;;  %vm43_vm4 = vcmp.eq.f32.partialorder %v29_v19, 0.0 }
  0x96   :  { %v38_v20 = vpop.xlane.xlu1 %37  ;;  %v32_v21 = vpop.xlane.xlu0 %31 }
  0x97   :  { %539 = vrsqrt.f32 %v38_v20  ;;  %vm62_vm5 = vcmp.eq.f32.partialorder %v38_v20, inf  ;;  %vm64_vm6 = vcmp.eq.f32.partialorder %v38_v20, 0.0  ;;  %v65_v40 = vand.u32 2147483648, %v38_v20 }
  0x98   :  { %541 = vrsqrt.f32 %v32_v21  ;;  %vm48_vm7 = vcmp.eq.f32.partialorder %v32_v21, inf  ;;  %v51_v43 = vand.u32 2147483648, %v32_v21  ;;  %vm50_vm8 = vcmp.eq.f32.partialorder %v32_v21, 0.0 }
  0x9a   :  { %v291_v22 = vpop.xlane.xlu1 %290 }
  0x9b   :  { %v292_v23 = vsub.f32 %v288_v12, %v291_v22 }
  0x9d   :  { %v536_v24 = vpop.eup %535  ;;  %v293_v25 = vmul.f32 1.442695, %v292_v23 }
  0x9e   :  { %v538_v26 = vpop.eup %537  ;;  %v54_v27 = vmul.f32 %v536_v24, %v35_v18 }
  0x9f   :  { %v40_v29 = vmul.f32 %v538_v26, %v29_v19  ;;  %543 = vpow2.f32 %v293_v25 }
  0xa0   :  { %v56_v30 = vsel %vm55_vm1, %v35_v18, %v54_v27 }
  0xa1   :  { %v540_v32 = vpop.eup %539  ;;  %v59_v33 = vsel %vm57_vm2, %v58_v28, %v56_v30  ;;  %v42_v34 = vsel %vm41_vm3, %v29_v19, %v40_v29 }
  0xa2   :  { %v542_v35 = vpop.eup %541  ;;  %v69_v36 = vmax.f32 %v59_v33, 1e-12  ;;  %v45_v37 = vsel %vm43_vm4, %v44_v31, %v42_v34  ;;  %v61_v38 = vmul.f32 %v540_v32, %v38_v20 }
  0xa3   :  { %v67_v39 = vmax.f32 %v45_v37, 1e-12  ;;  %v47_v41 = vmul.f32 %v542_v35, %v32_v21 }
  0xa4   :  { %545 = vrcp.f32 %v69_v36  ;;  %v63_v42 = vsel %vm62_vm5, %v38_v20, %v61_v38 }
  0xa5   :  { %547 = vrcp.f32 %v67_v39  ;;  %v66_v44 = vsel %vm64_vm6, %v65_v40, %v63_v42  ;;  %v49_v45 = vsel %vm48_vm7, %v32_v21, %v47_v41 }
  0xa6   :  { %v70_v46 = vmax.f32 %v66_v44, 1e-12  ;;  %v52_v47 = vsel %vm50_vm8, %v51_v43, %v49_v45 }
  0xa7   :  { %v68_v48 = vmax.f32 %v52_v47, 1e-12 }
  0xa8   :  { %549 = vrcp.f32 %v70_v46 }
  0xa9   :  { %v668_v49 = vpop.eup %543  ;;  %551 = vrcp.f32 %v68_v48  ;;  %v591_v48 = vmov 0.0|0.0  }
  0xaa   :  { %v295_v50 = vsel %vm26_vm0, %v668_v49, 0.0  ;;  %515 = vmatprep.subr.bf16.mxu1 %v591_v48 }
  0xab   :  { %296 = vadd.xlane.f32.xlu1 %v295_v50  ;;  %v593_v50 = vmov 0.0  }
  0xac   :  { %504 = vmatprep.mubr.msk.f32.mxu1 %vm592_vm10, %v593_v50 }
  0xae   :  { %v546_v51 = vpop.eup %545 }
  0xaf   :  { %v548_v52 = vpop.eup %547  ;;  %v76_v53 = vmul.f32 %v546_v51, %v623_v0 }
  0xb0   :  { %v72_v55 = vmul.f32 %v548_v52, %v628_v1 }
  0xb1   :  { %v81_v59 = vsel %vm26_vm0, %v76_v53, -inf }
  0xb2   :  { %v550_v54 = vpop.eup %549  ;;  %v79_v61 = vsel %vm26_vm0, %v72_v55, -inf }
  0xb3   :  { %v552_v56 = vpop.eup %551  ;;  %v78_v57 = vmul.f32 %v550_v54, %v633_v2 }
  0xb4   :  { %v74_v58 = vmul.f32 %v552_v56, %v644_v6 }
  0xb5   :  { %v82_v60 = vsel %vm26_vm0, %v78_v57, -inf }
  0xb6   :  { %v80_v62 = vsel %vm26_vm0, %v74_v58, -inf  ;;  %v84_v63 = vmax.f32 %v81_v59, %v82_v60  ;;  %v142_v3 = vpop.trf.xlu0 }
  0xb7   :  { %v83_v0 = vmax.f32 %v79_v61, %v80_v62  ;;  %476 = vmatprep.mubr.msk.f32.mxu0 %vm158_vm9, %v142_v3 }
  0xb9   :  { %v85_v1 = vmax.f32 %v83_v0, %v84_v63 }
  0xba   :  { %v143_v33 = vpop.trf.xlu0 }
  0xbb   :  { %v86_v4 = vrot.slane %v85_v1, 4 }
  0xbd   :  { %v87_v5 = vmax.f32 %v85_v1, %v86_v4 }
  0xbe   :  { %v144_v35 = vpop.trf.xlu0 }
  0xbf   :  { %v88_v2 = vrot.slane %v87_v5, 2 }
  0xc1   :  { %v89_v7 = vmax.f32 %v87_v5, %v88_v2 }
  0xc2   :  { %v145_v36 = vpop.trf.xlu0 }
  0xc3   :  { %v90_v6 = vrot.slane %v89_v7, 1 }
  0xc5   :  { %v91_v8 = vmax.f32 %v89_v7, %v90_v6 }
  0xc6   :  { %v146_v43 = vpop.trf.xlu0 }
  0xc7   :  { %v92_v9 = vsub.f32 %v72_v55, %v91_v8  ;;  %v93_v10 = vsub.f32 %v74_v58, %v91_v8  ;;  %v94_v11 = vsub.f32 %v76_v53, %v91_v8  ;;  %v95_v12 = vsub.f32 %v78_v57, %v91_v8  ;;  %v400_v8 = vld [vmem:[%s726_s3] sm:$0xff]  ;;  %s571_s3 = scalar_lea.vmem %s423_s7, 32 }
  0xc8   :  { %p573_p2 = scmp.lt.s32.totalorder %s571_s3, %s567_s8 }
  0xc9   :  { %v96_v13 = vmul.f32 1.442695, %v92_v9  ;;  %v98_v14 = vmul.f32 1.442695, %v93_v10  ;;  %v100_v15 = vmul.f32 1.442695, %v94_v11 }
  0xca   :  { %v102_v16 = vmul.f32 1.442695, %v95_v12  ;;  %v147_v45 = vpop.trf.xlu0  ;;  %p574_p3 = por %p573_p2, %p572_p1 }
  0xcb   :  { %553 = vpow2.f32 %v96_v13 }
  0xcc   :  { %555 = vpow2.f32 %v98_v14  ;;  %p575_p4 = pnand %p574_p3, %p568_p0 }
  0xcd   :  { %557 = vpow2.f32 %v100_v15 }
  0xce   :  { %559 = vpow2.f32 %v102_v16  ;;  %v148_v46 = vpop.trf.xlu0 }
  0xd2   :  { %v149_v47 = vpop.trf.xlu0 }
  0xd5   :  { %v554_v17 = vpop.eup %553 }
  0xd6   :  { %v556_v18 = vpop.eup %555  ;;  %v104_v19 = vsel %vm26_vm0, %v554_v17, 0.0 }
  0xd7   :  { %v558_v20 = vpop.eup %557  ;;  %v105_v21 = vsel %vm26_vm0, %v556_v18, 0.0 }
  0xd8   :  { %v560_v22 = vpop.eup %559  ;;  %v106_v23 = vadd.f32 %v105_v21, %v104_v19  ;;  %v107_v24 = vsel %vm26_vm0, %v558_v20, 0.0 }
  0xd9   :  { %v109_v26 = vsel %vm26_vm0, %v560_v22, 0.0 }
  0xda   :  { %v108_v25 = vadd.f32 %v107_v24, %v106_v23 }
  0xdc   :  { %v110_v27 = vadd.f32 %v109_v26, %v108_v25 }
  0xde   :  { %v111_v28 = vrot.slane %v110_v27, 4 }
  0xe0   :  { %v112_v29 = vadd.f32 %v111_v28, %v110_v27 }
  0xe2   :  { %v113_v30 = vrot.slane %v112_v29, 2 }
  0xe4   :  { %v114_v31 = vadd.f32 %v113_v30, %v112_v29 }
  0xe6   :  { %v115_v32 = vrot.slane %v114_v31, 1 }
  0xe8   :  { %v116_v34 = vadd.f32 %v115_v32, %v114_v31 }
  0xea   :  { %561 = vrcp.f32 %v116_v34 }
  0xf4   :  { %v562_v37 = vpop.eup %561 }
  0xf5   :  { %v118_v38 = vmul.f32 %v562_v37, %v554_v17  ;;  %v119_v39 = vmul.f32 %v562_v37, %v556_v18  ;;  %v120_v40 = vmul.f32 %v562_v37, %v558_v20  ;;  %v121_v41 = vmul.f32 %v562_v37, %v560_v22 }
  0xf7   :  { %v507_v42 = vpack.c.bf16 %v119_v39, %v118_v38  ;;  %v511_v44 = vpack.c.bf16 %v121_v41, %v120_v40 }
  0xf9   :  { %508 = vmatprep.subr.bf16.mxu0 %v507_v42 }
  0xfa   :  { %510 = vmatpush3.bf16.msra.mxu0 %v507_v42 }
  0xfb   :  { %512 = vmatprep.subr.bf16.mxu0 %v511_v44 }
  0xfe   :  { %514 = vmatpush3.bf16.msra.mxu0 %v511_v44 }
 0x101   :  { %477 = vmatmul.mubr.msk.f32.vlgmr.msra.gmra.mrb[0].mxu0 %vm158_vm9, %v143_v33 }
 0x102   :  { %479 = vmatprep.mubr.msk.f32.mxu0 %vm158_vm9, %v144_v35 }
 0x105   :  { %480 = vmatmul.mubr.msk.f32.gmra.mrb[2].mxu0 %vm158_vm9, %v145_v36 }
 0x106   :  { %482 = vmatprep.mubr.msk.f32.mxu0 %vm158_vm9, %v146_v43 }
 0x109   :  { %483 = vmatmul.mubr.msk.f32.gmra.mrb[4].mxu0 %vm158_vm9, %v147_v45 }
 0x10a   :  { %485 = vmatprep.mubr.msk.f32.mxu0 %vm158_vm9, %v148_v46 }
 0x10d   :  { %486 = vmatmul.mubr.msk.f32.gmra.mrb[6].mxu0 %vm158_vm9, %v149_v47 }
 0x138   :  { %v297_v3 = vpop.xlane.xlu1 %296 }
 0x139   :  { %563 = vrcp.f32 %v297_v3 }
 0x143   :  { %v564_v0 = vpop.eup %563 }
 0x144   :  { %v299_v1 = vmul.f32 %v564_v0, %v668_v49 }
 0x1d4   :  { %v478_v51 = vpop.f32.mrb[0].mxu0 }
 0x1d5   :  { %v249_v52 = vpop.f32.mrb[1].mxu0 }
 0x1d6   :  { %v516_v54 = vpack.c.bf16 %v478_v51, %v249_v52 }
 0x1d8   :  { %518 = vmatpush3.bf16.xpose.msk.msra.mxu1 %vm694_vm11, %v516_v54  ;;  %v481_v55 = vpop.f32.mrb[2].mxu0 }
 0x1d9   :  { %v259_v56 = vpop.f32.mrb[3].mxu0  ;;  %519 = vmatprep.subr.bf16.mxu1 %v591_v48 }
 0x1da   :  { %v520_v57 = vpack.c.bf16 %v481_v55, %v259_v56 }
 0x1dc   :  { %v484_v58 = vpop.f32.mrb[4].mxu0 }
 0x1dd   :  { %v269_v59 = vpop.f32.mrb[5].mxu0 }
 0x1de   :  { %v524_v60 = vpack.c.bf16 %v484_v58, %v269_v59 }
 0x1e0   :  { %522 = vmatpush3.bf16.xpose.msk.msra.mxu1 %vm694_vm11, %v520_v57  ;;  %v487_v61 = vpop.f32.mrb[6].mxu0 }
 0x1e1   :  { %523 = vmatprep.subr.bf16.mxu1 %v591_v48  ;;  %v279_v62 = vpop.f32.mrb[7].mxu0 }
 0x1e2   :  { %v528_v63 = vpack.c.bf16 %v487_v61, %v279_v62 }
 0x1e8   :  { %526 = vmatpush3.bf16.xpose.msk.msra.mxu1 %vm694_vm11, %v524_v60 }
 0x1e9   :  { %527 = vmatprep.subr.bf16.mxu1 %v591_v48 }
 0x1f0   :  { %530 = vmatpush3.bf16.xpose.msk.msra.mxu1 %vm694_vm11, %v528_v63 }
 0x1f7   :  { %505 = vmatmul.mubr.msk.f32.vlgmr.msra.gmra.mrb[0].mxu1 %vm26_vm0, %v299_v1 }
 0x2ca   :  { %v393_v4 = vpop.f32.mrb[0].mxu1 }
 0x2cb   :  { %v394_v5 = vadd.f32 1e-08, %v393_v4  ;;  %v506_v2 = vpop.f32.mrb[1].mxu1 }
 0x2cd   :  { %565 = vlog2.f32 %v394_v5 }
 0x2d7   :  { %v566_v7 = vpop.eup %565 }
 0x2d8   :  { %v398_v6 = vmul.f32 0.6931472, %v566_v7 }
 0x2da   :  { %v399_v9 = vsub.f32 0.0, %v398_v6 }
 0x2dc   :  { %v401_v10 = vmul.f32 %v400_v8, %v399_v9 }
 0x2de   :  { %v403_v11 = vsel %vm402_vm12, %v401_v10, 0.0 }
 0x2df   :  { %404 = vadd.xlane.f32.xlu1 %v403_v11 }
 0x36c   :  { %v405_v12 = vpop.xlane.xlu1 %404 }
 0x36d   :  { %v406_v13 = vrot.slane %v405_v12, 4 }
 0x36f   :  { %v407_v49 = vadd.f32 %v406_v13, %v405_v12 }
 0x371   :  { %v408_v14 = vrot.slane %v407_v49, 2 }
 0x373   :  { %v409_v15 = vadd.f32 %v408_v14, %v407_v49 }
 0x375   :  { %v410_v16 = vrot.slane %v409_v15, 1 }
 0x377   :  { %v411_v17 = vadd.f32 %v410_v16, %v409_v15 }
 0x379   :  { %v413_v18 = vmul.f32 0.125, %v411_v17 }
 0x37b   :  { %415 = vst.msk [vmem:[#allocation2] sm:$0x1] %vm414_vm13, %v413_v18 }
 0x37c   :  { %578 = shalt.err (!%p575_p4)
}
 0x37d   :  { %s579_s11 = scalar_lea.hbm %s727_s4, 16 }
 0x37e   :  { %p580_p5 = scmp.ne.s32.totalorder %s727_s4, %s579_s11  ;;  %p583_p6 = scmp.lt.u32.totalorder %s579_s11, %s727_s4 }
 0x380   :  { %p585_p7 = pnand %p583_p6, %p580_p5 }
 0x382   :  { %588 = shalt.err (!%p585_p7)
}
 0x383   :  { %425 = dma.vmem_to_hbm [thread:$0]  %s423_s7, 16, %s727_s4, [#allocation3]  }
 0x384   :  { %589 = dma.done.wait [#allocation3], 16  }
 0x385   :  { %590 = vsyncadd [#allocation3], 4294967280 }
 0x386   :  { %429 = vsyncpa [#allocation3], 1 }

</bundles_post_ra>
